<compile_context>
chip_gen: v7x
topology: tpu7x:2x2x1
jax: 0.10.0
libtpu: 0.0.40
codegen_flags: <defaults>
</compile_context>

<pallas_src>
import functools

import jax
import jax.numpy as jnp
from jax.experimental import pallas as pl
from jax.experimental.pallas import tpu as pltpu


# ---------------------------------------------------------------------------
# Kernel bodies
# ---------------------------------------------------------------------------

def _attention_body(xb, m, w1, b1, w2, *, mask_value, act_dtype):
    """Shared math for one (bb, L, D) block.  Returns (pooled, attn)."""
    bb, L, D = xb.shape

    # Hidden projection: ONE MXU matmul for every row of the block.
    # Only the matmul operand is cast to bf16 (no-op if x is already bf16);
    # the resident weight was cast once in the wrapper; accumulate in f32.
    x2 = xb.reshape(bb * L, D)
    h = jnp.dot(x2.astype(jnp.bfloat16), w1,
                preferred_element_type=jnp.float32)              # (bb*L, H) f32

    # tanh on the EUP; bf16 on v6e/v7x (bf16 EUP), f32 on v5e.
    t = jnp.tanh((h + b1).astype(act_dtype))                     # (bb*L, H)

    # (H -> 1) head as VPU multiply + lane reduction (w2 is f32, so the
    # product promotes back to f32 regardless of act_dtype).
    logit = jnp.sum(t * w2, axis=-1, keepdims=True)              # (bb*L, 1) f32
    logits = logit.reshape(bb, L, 1)                             # (bb, L, 1)

    # Multiplicative mask, exactly as in the PyTorch forward (skipped when the
    # caller passed mask=None — specialized kernel variant).
    if m is not None:
        logits = m * logits + (1.0 - m) * mask_value

    # Softmax over the sequence axis (dim=-2 of the (..., L, 1) attention).
    mx = jnp.max(logits, axis=1, keepdims=True)                  # (bb, 1, 1)
    e = jnp.exp(logits - mx)
    s = jnp.sum(e, axis=1, keepdims=True)
    attn = e * pl.reciprocal(s, approx=True)                     # (bb, L, 1) f32

    # Pooled output: out[b, :] = sum_l attn[b, l] * x[b, l, :]  (f32 accumulate;
    # xb may be bf16 and promotes against the f32 attn).
    pooled = jnp.sum(xb * attn, axis=1, keepdims=True)           # (bb, 1, D) f32
    return pooled, attn


def _attn_kernel_masked(x_ref, mask_ref, w1_ref, b1_ref, w2_ref,
                        out_ref, attn_ref, *, mask_value, act_dtype):
    pooled, attn = _attention_body(x_ref[...], mask_ref[...], w1_ref[...],
                                   b1_ref[...], w2_ref[...],
                                   mask_value=mask_value, act_dtype=act_dtype)
    out_ref[...] = pooled.astype(out_ref.dtype)
    attn_ref[...] = attn.astype(attn_ref.dtype)


def _attn_kernel_nomask(x_ref, w1_ref, b1_ref, w2_ref,
                        out_ref, attn_ref, *, act_dtype):
    pooled, attn = _attention_body(x_ref[...], None, w1_ref[...], b1_ref[...],
                                   w2_ref[...], mask_value=0.0,
                                   act_dtype=act_dtype)
    out_ref[...] = pooled.astype(out_ref.dtype)
    attn_ref[...] = attn.astype(attn_ref.dtype)


# ---------------------------------------------------------------------------
# Block-size / dtype heuristics
# ---------------------------------------------------------------------------

def _rup(n, m):
    return ((n + m - 1) // m) * m


def _default_act_dtype():
    """bf16 activations on chips with a bf16 EUP (v6e / v7x); f32 otherwise."""
    try:
        kind = jax.devices()[0].device_kind.lower()
    except Exception:  # pragma: no cover - defensive
        return jnp.float32
    for old in ("v2", "v3", "v4", "v5"):
        if old in kind:
            return jnp.float32
    return jnp.bfloat16


def _choose_block_b(B, L, D, x_itemsize, *,
                    target_x_bytes=8 << 20, vmem_budget=20 << 20):
    """Batch block sized by the double-buffered padded VMEM footprint.

    Aims for a multi-MiB x tile per grid step (amortizes ~0.35us/step pipeline
    overhead) while keeping the padded, double-buffered footprint of all
    per-step blocks under `vmem_budget` (safe on v7x's 64 MiB VMEM) and keeping
    >= 2 grid steps when the batch allows (megacore / v7x dual-TC sharding).
    """
    if B <= 1:
        return 1

    def step_vmem(bb):
        x_t = bb * _rup(L, 8) * _rup(D, 128) * x_itemsize       # x tile
        m_t = bb * _rup(L, 8) * 128 * 4                         # mask (bb,L,1)
        a_t = bb * _rup(L, 8) * 128 * 4                         # attn (bb,L,1)
        o_t = bb * 8 * _rup(D, 128) * 4                         # pooled (bb,1,D)
        return 2 * (x_t + m_t + a_t + o_t)                      # double-buffered

    row_bytes = max(L * D * x_itemsize, 1)
    bb = max(1, min(B, target_x_bytes // row_bytes))
    while bb > 1 and step_vmem(bb) > vmem_budget:
        bb = max(1, bb // 2)
    if bb >= B:
        bb = max(1, B // 2)          # keep >= 2 grid steps when possible
    while B % bb:                    # bb must divide B (simple index map)
        bb -= 1
    return bb


# ---------------------------------------------------------------------------
# Wrapper
# ---------------------------------------------------------------------------

def attention_forward(x, mask, w_linear, b_linear, w_out, *,
                      mask_value=-1e30, block_b=None, act_dtype=None):
    """Pallas TPU forward of elastst.Attention.

    x        : (..., L, d_model)   any float dtype (streamed natively)
    mask     : None, or float broadcastable to (..., L, 1) (1 keep / 0 mask)
    w_linear : (hin_d, d_model)    nn.Linear(d_model, hin_d).weight
    b_linear : (hin_d,)            nn.Linear(d_model, hin_d).bias
    w_out    : (1, hin_d)          nn.Linear(hin_d, 1, bias=False).weight
    Returns (pooled, attn): pooled (..., d_model), attn (..., L, 1), in x.dtype.
    """
    *lead, L, D = x.shape
    lead = tuple(int(s) for s in lead)
    L, D = int(L), int(D)
    B = 1
    for s in lead:
        B *= int(s)
    H = int(w_linear.shape[0])

    x = jnp.asarray(x)
    if x.dtype not in (jnp.float32, jnp.bfloat16, jnp.float16):
        x = x.astype(jnp.float32)
    xr = x.reshape(B, L, D)                                 # native dtype

    # Resident parameters (cast once here, not per grid step).
    w1t = jnp.asarray(w_linear, jnp.float32).T.astype(jnp.bfloat16)  # (D, H)
    b1r = jnp.asarray(b_linear, jnp.float32).reshape(1, H)
    w2r = jnp.asarray(w_out, jnp.float32).reshape(1, H)

    if act_dtype is None:
        act_dtype = _default_act_dtype()

    bb = block_b if block_b is not None else _choose_block_b(
        B, L, D, jnp.dtype(xr.dtype).itemsize)
    assert bb >= 1 and B % bb == 0, (B, bb)
    nb = B // bb

    in_specs = [pl.BlockSpec((bb, L, D), lambda i: (i, 0, 0))]   # x
    args = [xr]
    if mask is not None:
        mf = jnp.broadcast_to(jnp.asarray(mask, jnp.float32),
                              lead + (L, 1)).reshape(B, L, 1)
        in_specs.append(pl.BlockSpec((bb, L, 1), lambda i: (i, 0, 0)))
        args.append(mf)
        kernel = functools.partial(_attn_kernel_masked,
                                   mask_value=float(mask_value),
                                   act_dtype=act_dtype)
    else:
        kernel = functools.partial(_attn_kernel_nomask, act_dtype=act_dtype)

    in_specs += [
        pl.BlockSpec((D, H), lambda i: (0, 0)),   # w1 (resident)
        pl.BlockSpec((1, H), lambda i: (0, 0)),   # b1 (resident)
        pl.BlockSpec((1, H), lambda i: (0, 0)),   # w2 (resident)
    ]
    args += [w1t, b1r, w2r]

    out_dtype = x.dtype
    pooled, attn = pl.pallas_call(
        kernel,
        out_shape=(
            jax.ShapeDtypeStruct((B, 1, D), out_dtype),
            jax.ShapeDtypeStruct((B, L, 1), out_dtype),
        ),
        grid_spec=pltpu.PrefetchScalarGridSpec(
            num_scalar_prefetch=0,
            grid=(nb,),
            in_specs=in_specs,
            out_specs=[
                pl.BlockSpec((bb, 1, D), lambda i: (i, 0, 0)),   # pooled
                pl.BlockSpec((bb, L, 1), lambda i: (i, 0, 0)),   # attn
            ],
        ),
        compiler_params=pltpu.CompilerParams(
            dimension_semantics=("parallel",),
            vmem_limit_bytes=40 * 1024 * 1024),
    )(*args)

    return pooled.reshape(lead + (D,)), attn.reshape(lead + (L, 1))


# ---------------------------------------------------------------------------
# Pure-JAX reference (mirrors the PyTorch forward in f32)
# ---------------------------------------------------------------------------

def _reference(x, mask, w_linear, b_linear, w_out, mask_value=-1e30):
    x = jnp.asarray(x, jnp.float32)
    attn = jnp.tanh(x @ w_linear.T + b_linear) @ w_out.T        # (..., L, 1)
    if mask is not None:
        m = jnp.asarray(mask, jnp.float32)
        attn = m * attn + (1.0 - m) * mask_value
    attn = jax.nn.softmax(attn, axis=-2)
    pooled = jnp.squeeze(jnp.swapaxes(x, -1, -2) @ attn, -1)    # (..., d_model)
    return pooled, attn


if __name__ == "__main__":
    # Small deterministic example: leading dims (4, 8), seq L=16, d_model=32.
    Bdim, Cdim, L, d_model, hin_d = 4, 8, 16, 32, 32
    key = jax.random.PRNGKey(0)
    kx, km, kw1, kb1, kw2 = jax.random.split(key, 5)

    x = jax.random.normal(kx, (Bdim, Cdim, L, d_model), jnp.float32)
    mask = (jax.random.uniform(km, (Bdim, Cdim, L, 1)) > 0.25).astype(jnp.float32)
    mask = mask.at[0, 0].set(0.0)   # exercise the fully-masked-row branch

    lim1 = 1.0 / (d_model ** 0.5)
    w_linear = jax.random.uniform(kw1, (hin_d, d_model), jnp.float32, -lim1, lim1)
    b_linear = jax.random.uniform(kb1, (hin_d,), jnp.float32, -lim1, lim1)
    lim2 = 1.0 / (hin_d ** 0.5)
    w_out = jax.random.uniform(kw2, (1, hin_d), jnp.float32, -lim2, lim2)

    # --- f32 x, with mask --------------------------------------------------
    pooled, attn = attention_forward(x, mask, w_linear, b_linear, w_out)
    pooled = jax.block_until_ready(pooled)
    attn = jax.block_until_ready(attn)
    ref_pooled, ref_attn = _reference(x, mask, w_linear, b_linear, w_out)
    assert pooled.shape == (Bdim, Cdim, d_model)
    assert attn.shape == (Bdim, Cdim, L, 1)
    # bf16 matmul operands / activations + approx reciprocal => loose tolerances.
    assert jnp.allclose(pooled, ref_pooled, atol=2e-2, rtol=2e-2), \
        float(jnp.max(jnp.abs(pooled - ref_pooled)))
    assert jnp.allclose(attn, ref_attn, atol=2e-2, rtol=2e-2), \
        float(jnp.max(jnp.abs(attn - ref_attn)))

    # --- f32 x, mask=None (module default path, specialized kernel) ---------
    pooled2, attn2 = attention_forward(x, None, w_linear, b_linear, w_out)
    pooled2 = jax.block_until_ready(pooled2)
    attn2 = jax.block_until_ready(attn2)
    ref_p2, ref_a2 = _reference(x, None, w_linear, b_linear, w_out)
    assert jnp.allclose(pooled2, ref_p2, atol=2e-2, rtol=2e-2)
    assert jnp.allclose(attn2, ref_a2, atol=2e-2, rtol=2e-2)

    # --- bf16 x streamed natively (no wrapper f32 upcast) --------------------
    xb16 = x.astype(jnp.bfloat16)
    pooled3, attn3 = attention_forward(xb16, mask, w_linear, b_linear, w_out)
    pooled3 = jax.block_until_ready(pooled3)
    attn3 = jax.block_until_ready(attn3)
    ref_p3, ref_a3 = _reference(xb16.astype(jnp.float32), mask,
                                w_linear, b_linear, w_out)
    assert pooled3.dtype == jnp.bfloat16 and attn3.dtype == jnp.bfloat16
    assert jnp.allclose(pooled3.astype(jnp.float32), ref_p3, atol=3e-2, rtol=3e-2)
    assert jnp.allclose(attn3.astype(jnp.float32), ref_a3, atol=3e-2, rtol=3e-2)

    print("KERNEL_OK")
</pallas_src>

<mosaic_0001>
module attributes {stable_mosaic.version = 11 : i64} {
  func.func @_attn_kernel_masked(%arg0: i32, %arg1: memref<16x16x32xf32, #tpu.memory_space<vmem>>, %arg2: memref<16x16x1xf32, #tpu.memory_space<vmem>>, %arg3: memref<32x32xbf16, #tpu.memory_space<vmem>>, %arg4: memref<1x32xf32, #tpu.memory_space<vmem>>, %arg5: memref<1x32xf32, #tpu.memory_space<vmem>>, %arg6: memref<16x1x32xf32, #tpu.memory_space<vmem>>, %arg7: memref<16x16x1xf32, #tpu.memory_space<vmem>>) attributes {dimension_semantics = [#tpu.dimension_semantics<parallel>], iteration_bounds = array<i64: 2>, scalar_prefetch = 0 : i64, scratch_operands = 0 : i64, tpu.core_type = #tpu.core_type<tc>, window_params = [{transform_indices = @transform_0, window_bounds = array<i64: 16, 16, 32>}, {transform_indices = @transform_1, window_bounds = array<i64: 16, 16, 1>}, {pipeline_mode = #tpu.pipeline_mode<synchronous>, transform_indices = @transform_2, window_bounds = array<i64: 32, 32>}, {pipeline_mode = #tpu.pipeline_mode<synchronous>, transform_indices = @transform_3, window_bounds = array<i64: 1, 32>}, {pipeline_mode = #tpu.pipeline_mode<synchronous>, transform_indices = @transform_4, window_bounds = array<i64: 1, 32>}, {transform_indices = @transform_5, window_bounds = array<i64: 16, 1, 32>}, {transform_indices = @transform_6, window_bounds = array<i64: 16, 16, 1>}]} {
    %c0 = arith.constant 0 : index
    %c0_0 = arith.constant 0 : index
    %c0_1 = arith.constant 0 : index
    %0 = vector.load %arg1[%c0, %c0_0, %c0_1] : memref<16x16x32xf32, #tpu.memory_space<vmem>>, vector<16x16x32xf32>
    %c0_2 = arith.constant 0 : index
    %c0_3 = arith.constant 0 : index
    %c0_4 = arith.constant 0 : index
    %1 = vector.load %arg2[%c0_2, %c0_3, %c0_4] : memref<16x16x1xf32, #tpu.memory_space<vmem>>, vector<16x16x1xf32>
    %c0_5 = arith.constant 0 : index
    %c0_6 = arith.constant 0 : index
    %2 = vector.load %arg3[%c0_5, %c0_6] : memref<32x32xbf16, #tpu.memory_space<vmem>>, vector<32x32xbf16>
    %c0_7 = arith.constant 0 : index
    %c0_8 = arith.constant 0 : index
    %3 = vector.load %arg4[%c0_7, %c0_8] : memref<1x32xf32, #tpu.memory_space<vmem>>, vector<1x32xf32>
    %c0_9 = arith.constant 0 : index
    %c0_10 = arith.constant 0 : index
    %4 = vector.load %arg5[%c0_9, %c0_10] : memref<1x32xf32, #tpu.memory_space<vmem>>, vector<1x32xf32>
    %5 = vector.shape_cast %0 : vector<16x16x32xf32> to vector<256x32xf32>
    %6 = arith.truncf %5 : vector<256x32xf32> to vector<256x32xbf16>
    %cst = arith.constant dense<0.000000e+00> : vector<256x32xf32>
    %7 = tpu.matmul %6, %2, %cst {dimension_numbers = #tpu.dot_dimension_numbers<[1], [0], [0], [1], [0, 0, 1, 1], [], []>} : vector<256x32xbf16>, vector<32x32xbf16>, vector<256x32xf32> -> vector<256x32xf32>
    %8 = vector.broadcast %3 : vector<1x32xf32> to vector<256x32xf32>
    %9 = arith.addf %7, %8 : vector<256x32xf32>
    %10 = arith.truncf %9 : vector<256x32xf32> to vector<256x32xbf16>
    %11 = math.tanh %10 : vector<256x32xbf16>
    %12 = arith.extf %11 : vector<256x32xbf16> to vector<256x32xf32>
    %13 = vector.broadcast %4 : vector<1x32xf32> to vector<256x32xf32>
    %14 = arith.mulf %12, %13 : vector<256x32xf32>
    %cst_11 = arith.constant dense<0.000000e+00> : vector<256xf32>
    %15 = vector.multi_reduction <add>, %14, %cst_11 [1] : vector<256x32xf32> to vector<256xf32>
    %16 = vector.shape_cast %15 : vector<256xf32> to vector<256x1xf32>
    %17 = vector.shape_cast %16 : vector<256x1xf32> to vector<16x16x1xf32>
    %18 = arith.mulf %1, %17 : vector<16x16x1xf32>
    %cst_12 = arith.constant 1.000000e+00 : f32
    %19 = vector.broadcast %cst_12 : f32 to vector<16x16x1xf32>
    %20 = arith.subf %19, %1 : vector<16x16x1xf32>
    %cst_13 = arith.constant -1.000000e+30 : f32
    %21 = vector.broadcast %cst_13 : f32 to vector<16x16x1xf32>
    %22 = arith.mulf %20, %21 : vector<16x16x1xf32>
    %23 = arith.addf %18, %22 : vector<16x16x1xf32>
    %cst_14 = arith.constant dense<0xFF800000> : vector<16x1xf32>
    %24 = vector.multi_reduction <maximumf>, %23, %cst_14 [1] : vector<16x16x1xf32> to vector<16x1xf32>
    %25 = vector.shape_cast %24 : vector<16x1xf32> to vector<16x1x1xf32>
    %26 = vector.broadcast %25 : vector<16x1x1xf32> to vector<16x16x1xf32>
    %27 = arith.subf %23, %26 : vector<16x16x1xf32>
    %28 = math.exp %27 : vector<16x16x1xf32>
    %cst_15 = arith.constant dense<0.000000e+00> : vector<16x1xf32>
    %29 = vector.multi_reduction <add>, %28, %cst_15 [1] : vector<16x16x1xf32> to vector<16x1xf32>
    %30 = vector.shape_cast %29 : vector<16x1xf32> to vector<16x1x1xf32>
    %31 = tpu.reciprocal %30 {approx = true} : vector<16x1x1xf32> -> vector<16x1x1xf32>
    %32 = vector.broadcast %31 : vector<16x1x1xf32> to vector<16x16x1xf32>
    %33 = arith.mulf %28, %32 : vector<16x16x1xf32>
    %34 = vector.broadcast %33 : vector<16x16x1xf32> to vector<16x16x32xf32>
    %35 = arith.mulf %0, %34 : vector<16x16x32xf32>
    %cst_16 = arith.constant dense<0.000000e+00> : vector<16x32xf32>
    %36 = vector.multi_reduction <add>, %35, %cst_16 [1] : vector<16x16x32xf32> to vector<16x32xf32>
    %37 = vector.shape_cast %36 : vector<16x32xf32> to vector<16x1x32xf32>
    %c0_17 = arith.constant 0 : index
    %c0_18 = arith.constant 0 : index
    %c0_19 = arith.constant 0 : index
    %38 = vector.load %arg6[%c0_17, %c0_18, %c0_19] : memref<16x1x32xf32, #tpu.memory_space<vmem>>, vector<16x1x32xf32>
    tpu.vector_store %arg6[%c0_17, %c0_18, %c0_19], %37 {strides = array<i32>} : memref<16x1x32xf32, #tpu.memory_space<vmem>>, vector<16x1x32xf32>,
    %c0_20 = arith.constant 0 : index
    %c0_21 = arith.constant 0 : index
    %c0_22 = arith.constant 0 : index
    %39 = vector.load %arg7[%c0_20, %c0_21, %c0_22] : memref<16x16x1xf32, #tpu.memory_space<vmem>>, vector<16x16x1xf32>
    tpu.vector_store %arg7[%c0_20, %c0_21, %c0_22], %33 {strides = array<i32>} : memref<16x16x1xf32, #tpu.memory_space<vmem>>, vector<16x16x1xf32>,
    return
  }
  func.func @transform_0(%arg0: i32) -> (i32, i32, i32) {
    %c0_i32 = arith.constant 0 : i32
    %c0_i32_0 = arith.constant 0 : i32
    %c0_i32_1 = arith.constant 0 : i32
    return %arg0, %c0_i32, %c0_i32_0 : i32, i32, i32
  }
  func.func @transform_1(%arg0: i32) -> (i32, i32, i32) {
    %c0_i32 = arith.constant 0 : i32
    %c0_i32_0 = arith.constant 0 : i32
    %c0_i32_1 = arith.constant 0 : i32
    return %arg0, %c0_i32, %c0_i32_0 : i32, i32, i32
  }
  func.func @transform_2(%arg0: i32) -> (i32, i32) {
    %c0_i32 = arith.constant 0 : i32
    %c0_i32_0 = arith.constant 0 : i32
    %c0_i32_1 = arith.constant 0 : i32
    return %c0_i32, %c0_i32_0 : i32, i32
  }
  func.func @transform_3(%arg0: i32) -> (i32, i32) {
    %c0_i32 = arith.constant 0 : i32
    %c0_i32_0 = arith.constant 0 : i32
    %c0_i32_1 = arith.constant 0 : i32
    return %c0_i32, %c0_i32_0 : i32, i32
  }
  func.func @transform_4(%arg0: i32) -> (i32, i32) {
    %c0_i32 = arith.constant 0 : i32
    %c0_i32_0 = arith.constant 0 : i32
    %c0_i32_1 = arith.constant 0 : i32
    return %c0_i32, %c0_i32_0 : i32, i32
  }
  func.func @transform_5(%arg0: i32) -> (i32, i32, i32) {
    %c0_i32 = arith.constant 0 : i32
    %c0_i32_0 = arith.constant 0 : i32
    %c0_i32_1 = arith.constant 0 : i32
    return %arg0, %c0_i32, %c0_i32_0 : i32, i32, i32
  }
  func.func @transform_6(%arg0: i32) -> (i32, i32, i32) {
    %c0_i32 = arith.constant 0 : i32
    %c0_i32_0 = arith.constant 0 : i32
    %c0_i32_1 = arith.constant 0 : i32
    return %arg0, %c0_i32, %c0_i32_0 : i32, i32, i32
  }
}

</mosaic_0001>

<bundles_post_ra>
// kernel: tpu_custom_call.1
= control target key start
LH: loop header
LB: loop body
LE: loop exit
PB: predicated region body
PF: predicated region fallthrough
CT: control target
= control target key end

     0   :  { %12 = vsyncpa [#allocation3], 0  ;;  %s3413_s0 = inlined_call_operand.vmem [shape: f32[32,16,32], index: 0, kind: input, shape index: {}]   ;;  %s3414_s1 = inlined_call_operand.vmem [shape: f32[32,16,1], index: 1, kind: input, shape index: {}]   ;;  %s3415_s2 = inlined_call_operand.vmem [shape: bf16[32,32], index: 2, kind: input, shape index: {}]   ;;  %s3416_s3 = inlined_call_operand.vmem [shape: f32[1,32], index: 3, kind: input, shape index: {}]   ;;  %s3417_s4 = inlined_call_operand.vmem [shape: f32[1,32], index: 4, kind: input, shape index: {}]   ;;  %s3418_s5 = inlined_call_operand.hbm [shape: f32[32,1,32], index: 5, kind: output, shape index: {0}]   ;;  %s3419_s6 = inlined_call_operand.vmem [shape: f32[32,16,1], index: 6, kind: output, shape index: {1}]  }
   0x1   :  { %14 = vsyncpa [#allocation3 + $0x1], 0  ;;  %s2290_s21 = smov 0   ;;  %s2292_s22 = smov 0  }
   0x2   :  { %s2294_s23 = smov 0   ;;  %s2296_s24 = smov 0  }
   0x3 LB: > { %s2311_s25 = sadd.s32 4294967295, %s2249_s24   ;;  %s1880_s26 = sadd.s32 4294967294, %s2249_s24   ;;  %s2249_s24 = sphi %s2296_s24, %s3463_s24   ;;  %s2245_s23 = sphi %s2294_s23, %s3462_s23   ;;  %s2241_s22 = sphi %s2292_s22, %s3461_s22   ;;  %s2237_s21 = sphi %s2290_s21, %s3460_s21  }
   0x4   : > { %s2315_s27 = sadd.s32 1, %s2249_s24   ;;  %s142_s28 = sadd.s32 1, %s2245_s23 }
   0x5   : > { %s139_s29 = ssub.s32 %s2249_s24, %s2315_s27  ;;  %p152_p0 = scmp.ne.s32.totalorder %s2245_s23, %s2241_s22 }
   0x6   : > { %p140_p1 = scmp.eq.s32.totalorder %s139_s29, 0  ;;  %p153_p2 = scmp.eq.s32.totalorder %s2311_s25, 1 }
   0x7   : > { %p158_p3 = scmp.ne.s32.totalorder %s2241_s22, %s2237_s21  ;;  %p159_p4 = scmp.eq.s32.totalorder %s1880_s26, 1 }
   0x8   : > { %s2326_s30 = scalar_select %p140_p1, %s2245_s23, %s142_s28  }
   0x9   : > { %p2328_p5 = por %p153_p2, %p152_p0  ;;  %p2332_p6 = por %p159_p4, %p158_p3 }
   0xa   : > { %p1883_p7 = scmp.ge.s32.totalorder %s2249_s24, 1  ;;  %p232_p8 = scmp.lt.s32.totalorder %s2249_s24, 3 }
   0xc   : > { %p233_p9 = pnand %p1883_p7, %p232_p8 }
   0xe   : > { %236 = sbr.rel (%p233_p9) target bundleno = 749 (0x2ed), region = 40 }
  0x15   : > { %v2025_v0 = vld [vmem:[%s3415_s2] sm:$0xff]   ;;  %s1885_s11 = sshll.u32 %s2311_s25, 4  ;;  %v2026_v1 = vld [vmem:[%s3415_s2 + $0x8] sm:$0xff]   ;;  %vm402_vm0 = vcmask 261120   ;;  %vm938_vm1 = vcmask 7168   ;;  %s264_s13 = sand.u32 1, %s2241_s22  }
  0x16   : > { %p276_p10 = scmp.lt.s32.totalorder %s1885_s11, 31  ;;  %1941 = vmatprep.subr.bf16.mxu0 %v2025_v0  ;;  %1977 = vmatprep.subr.bf16.mxu1 %v2025_v0  ;;  %v2404_v51 = vld [vmem:[%s3416_s3] ss:$0 sm:$0xff]  ;;  %vm1707_vm2 = vcmask 253952   ;;  %s1922_s16 = sshll.u32 %s2311_s25, 8 }
  0x17   : > { %1942 = vmatpush3.bf16.msra.mxu0 %v2025_v0  ;;  %1979 = vmatpush3.bf16.msra.mxu1 %v2025_v0  ;;  %s3364_s20 = scalar_lea.hbm %s3418_s5, %s1922_s16  ;;  %s3372_s26 = scalar_lea.sflag [#allocation3], %s264_s13 }
  0x18   : > { %s3465_s11 = smov (!%p276_p10, %s1885_s11), 31  ;;  %1943 = vmatprep.subr.bf16.mxu0 %v2026_v1  ;;  %1978 = vmatprep.subr.bf16.mxu1 %v2026_v1  ;;  %s2252_s28 = smov [#allocation2]  }
  0x19   : > { %s2345_s14 = sshll.u32 %s3465_s11, 4  ;;  %s2191_s29 = sshll.u32 %s2252_s28, 4  ;;  %s2192_s29 = int_to_ptr.vmem [resolvable:$false] %s2191_s29 }
  0x1a   : > { %s2351_s17 = scalar_lea.vmem %s3413_s0, %s2345_s14  ;;  %s2529_s9 = scalar_lea.vmem %s3414_s1, %s2345_s14 }
  0x1b   : > { %1944 = vmatpush3.bf16.msra.mxu0 %v2026_v1  ;;  %1980 = vmatpush3.bf16.msra.mxu1 %v2026_v1  ;;  %v298_v2 = vld [vmem:[%s2351_s17] sm:$0xff]  ;;  %v299_v3 = vld [vmem:[%s2351_s17 + $0x8] sm:$0xff]  ;;  %v300_v7 = vld [vmem:[%s2351_s17 + $0x10] sm:$0xff]  ;;  %s3111_s12 = scalar_lea.vmem %s3419_s6, %s2345_s14  ;;  %s1884_s14 = sshll.u32 %s264_s13, 4 }
  0x1c   : > { %v314_v4 = vld [vmem:[%s2351_s17 + $0x80] sm:$0xff]  ;;  %v368_v5 = vpack.c.bf16 %v299_v3, %v298_v2  ;;  %v315_v6 = vld [vmem:[%s2351_s17 + $0x88] sm:$0xff]  ;;  %v301_v8 = vld [vmem:[%s2351_s17 + $0x18] sm:$0xff]  ;;  %s3279_s15 = scalar_lea.vmem [#allocation2], %s1884_s14 }
  0x1d   : > { %v376_v9 = vpack.c.bf16 %v315_v6, %v314_v4  ;;  %v369_v10 = vpack.c.bf16 %v301_v8, %v300_v7  ;;  %v316_v11 = vld [vmem:[%s2351_s17 + $0x90] sm:$0xff]  ;;  %v317_v12 = vld [vmem:[%s2351_s17 + $0x98] sm:$0xff]  ;;  %v302_v13 = vld [vmem:[%s2351_s17 + $0x20] sm:$0xff] }
  0x1e   : > { %1945 = vmatprep.mubr.msk.bf16.mxu0 %vm402_vm0, %v368_v5  ;;  %v377_v14 = vpack.c.bf16 %v317_v12, %v316_v11  ;;  %v303_v15 = vld [vmem:[%s2351_s17 + $0x28] sm:$0xff]  ;;  %v318_v17 = vld [vmem:[%s2351_s17 + $0xa0] sm:$0xff]  ;;  %v304_v19 = vld [vmem:[%s2351_s17 + $0x30] sm:$0xff] }
  0x1f   : > { %1961 = vmatprep.mubr.msk.bf16.mxu1 %vm402_vm0, %v376_v9  ;;  %1946 = vmatmul.mubr.msk.bf16.vlgmr.msra.gmra.mrb[0].mxu0 %vm402_vm0, %v369_v10  ;;  %v370_v16 = vpack.c.bf16 %v303_v15, %v302_v13  ;;  %v319_v18 = vld [vmem:[%s2351_s17 + $0xa8] sm:$0xff]  ;;  %v305_v20 = vld [vmem:[%s2351_s17 + $0x38] sm:$0xff]  ;;  %v320_v22 = vld [vmem:[%s2351_s17 + $0xb0] sm:$0xff] }
  0x20   : > { %1962 = vmatmul.mubr.msk.bf16.vlgmr.msra.gmra.mrb[0].mxu1 %vm402_vm0, %v377_v14  ;;  %v378_v21 = vpack.c.bf16 %v319_v18, %v318_v17  ;;  %v321_v23 = vld [vmem:[%s2351_s17 + $0xb8] sm:$0xff]  ;;  %v306_v24 = vld [vmem:[%s2351_s17 + $0x40] sm:$0xff]  ;;  %v307_v25 = vld [vmem:[%s2351_s17 + $0x48] sm:$0xff]  ;;  %v371_v28 = vpack.c.bf16 %v305_v20, %v304_v19 }
  0x21   : > { %1949 = vmatprep.mubr.msk.bf16.mxu0 %vm402_vm0, %v370_v16  ;;  %v322_v26 = vld [vmem:[%s2351_s17 + $0xc0] sm:$0xff]  ;;  %v323_v27 = vld [vmem:[%s2351_s17 + $0xc8] sm:$0xff]  ;;  %v379_v29 = vpack.c.bf16 %v321_v23, %v320_v22  ;;  %v372_v30 = vpack.c.bf16 %v307_v25, %v306_v24  ;;  %v308_v32 = vld [vmem:[%s2351_s17 + $0x50] sm:$0xff] }
  0x22   : > { %1965 = vmatprep.mubr.msk.bf16.mxu1 %vm402_vm0, %v378_v21  ;;  %v380_v31 = vpack.c.bf16 %v323_v27, %v322_v26  ;;  %v309_v33 = vld [vmem:[%s2351_s17 + $0x58] sm:$0xff]  ;;  %v324_v34 = vld [vmem:[%s2351_s17 + $0xd0] sm:$0xff]  ;;  %v310_v36 = vld [vmem:[%s2351_s17 + $0x60] sm:$0xff] }
  0x23   : > { %v325_v35 = vld [vmem:[%s2351_s17 + $0xd8] sm:$0xff]  ;;  %v311_v37 = vld [vmem:[%s2351_s17 + $0x68] sm:$0xff]  ;;  %v326_v38 = vld [vmem:[%s2351_s17 + $0xe0] sm:$0xff]  ;;  %v373_v40 = vpack.c.bf16 %v309_v33, %v308_v32 }
  0x24   : > { %v327_v39 = vld [vmem:[%s2351_s17 + $0xe8] sm:$0xff]  ;;  %v381_v41 = vpack.c.bf16 %v325_v35, %v324_v34  ;;  %v374_v42 = vpack.c.bf16 %v311_v37, %v310_v36  ;;  %v312_v44 = vld [vmem:[%s2351_s17 + $0x70] sm:$0xff]  ;;  %v313_v45 = vld [vmem:[%s2351_s17 + $0x78] sm:$0xff] }
  0x25   : > { %v382_v43 = vpack.c.bf16 %v327_v39, %v326_v38  ;;  %v328_v46 = vld [vmem:[%s2351_s17 + $0xf0] sm:$0xff]  ;;  %v329_v47 = vld [vmem:[%s2351_s17 + $0xf8] sm:$0xff]  ;;  %v375_v48 = vpack.c.bf16 %v313_v45, %v312_v44 }
  0x26   : > { %v383_v49 = vpack.c.bf16 %v329_v47, %v328_v46 }
  0x27   : > { %1950 = vmatmul.mubr.msk.bf16.gmra.mrb[4].mxu0 %vm402_vm0, %v371_v28 }
  0x28   : > { %1966 = vmatmul.mubr.msk.bf16.gmra.mrb[4].mxu1 %vm402_vm0, %v379_v29  ;;  %1953 = vmatprep.mubr.msk.bf16.mxu0 %vm402_vm0, %v372_v30 }
  0x29   : > { %1969 = vmatprep.mubr.msk.bf16.mxu1 %vm402_vm0, %v380_v31  ;;  %v2425_v31 = vld [vmem:[%s3417_s4] ss:$0 sm:$0xff] }
  0x2f   : > { %1954 = vmatmul.mubr.msk.bf16.gmra.mrb[8].mxu0 %vm402_vm0, %v373_v40 }
  0x30   : > { %1970 = vmatmul.mubr.msk.bf16.gmra.mrb[8].mxu1 %vm402_vm0, %v381_v41  ;;  %1957 = vmatprep.mubr.msk.bf16.mxu0 %vm402_vm0, %v374_v42 }
  0x31   : > { %1973 = vmatprep.mubr.msk.bf16.mxu1 %vm402_vm0, %v382_v43 }
  0x37   : > { %1958 = vmatmul.mubr.msk.bf16.gmra.mrb[12].mxu0 %vm402_vm0, %v375_v48 }
  0x38   : > { %1974 = vmatmul.mubr.msk.bf16.gmra.mrb[12].mxu1 %vm402_vm0, %v383_v49 }
  0xf2   : > { %v1947_v50 = vpop.f32.mrb[0].mxu0 }
  0xf3   : > { %v1963_v52 = vpop.f32.mrb[0].mxu1  ;;  %v485_v53 = vpop.f32.mrb[1].mxu0  ;;  %v494_v57 = vadd.f32 %v1947_v50, %v2404_v51 }
  0xf4   : > { %v558_v54 = vadd.f32 %v1963_v52, %v2404_v51  ;;  %v549_v55 = vpop.f32.mrb[1].mxu1  ;;  %v1948_v56 = vpop.f32.mrb[2].mxu0  ;;  %v486_v62 = vadd.f32 %v2404_v51, %v485_v53 }
  0xf5   : > { %v550_v58 = vadd.f32 %v2404_v51, %v549_v55  ;;  %v497_v59 = vadd.f32 %v1948_v56, %v2404_v51  ;;  %v1964_v60 = vpop.f32.mrb[2].mxu1  ;;  %v488_v61 = vpop.f32.mrb[3].mxu0 }
  0xf6   : > { %v561_v63 = vadd.f32 %v1964_v60, %v2404_v51  ;;  %v489_v0 = vadd.f32 %v2404_v51, %v488_v61  ;;  %v552_v1 = vpop.f32.mrb[3].mxu1 }
  0xf7   : > { %v613_v2 = vpack.c.bf16 %v497_v59, %v494_v57  ;;  %v553_v3 = vadd.f32 %v2404_v51, %v552_v1 }
  0xf8   : > { %v621_v4 = vpack.c.bf16 %v561_v63, %v558_v54  ;;  %v612_v5 = vpack.c.bf16 %v489_v0, %v486_v62 }
  0xf9   : > { %2027 = vtanh.bf16 %v613_v2  ;;  %v620_v6 = vpack.c.bf16 %v553_v3, %v550_v58 }
  0xfa   : > { %2029 = vtanh.bf16 %v621_v4  ;;  %v1951_v7 = vpop.f32.mrb[4].mxu0 }
  0xfb   : > { %2031 = vtanh.bf16 %v612_v5  ;;  %v510_v8 = vadd.f32 %v1951_v7, %v2404_v51  ;;  %v501_v9 = vpop.f32.mrb[5].mxu0  ;;  %v1967_v10 = vpop.f32.mrb[4].mxu1 }
  0xfc   : > { %v502_v11 = vadd.f32 %v2404_v51, %v501_v9  ;;  %v1952_v12 = vpop.f32.mrb[6].mxu0  ;;  %v574_v13 = vadd.f32 %v1967_v10, %v2404_v51  ;;  %v565_v14 = vpop.f32.mrb[5].mxu1  ;;  %2033 = vtanh.bf16 %v620_v6 }
  0xfd   : > { %v513_v15 = vadd.f32 %v1952_v12, %v2404_v51  ;;  %v566_v16 = vadd.f32 %v2404_v51, %v565_v14  ;;  %v1968_v17 = vpop.f32.mrb[6].mxu1  ;;  %v504_v18 = vpop.f32.mrb[7].mxu0 }
  0xfe   : > { %v577_v19 = vadd.f32 %v1968_v17, %v2404_v51  ;;  %v505_v20 = vadd.f32 %v2404_v51, %v504_v18  ;;  %v568_v21 = vpop.f32.mrb[7].mxu1 }
  0xff   : > { %v615_v22 = vpack.c.bf16 %v513_v15, %v510_v8  ;;  %v569_v23 = vadd.f32 %v2404_v51, %v568_v21 }
 0x100   : > { %v623_v24 = vpack.c.bf16 %v577_v19, %v574_v13  ;;  %v614_v25 = vpack.c.bf16 %v505_v20, %v502_v11 }
 0x101   : > { %2035 = vtanh.bf16 %v615_v22  ;;  %v622_v26 = vpack.c.bf16 %v569_v23, %v566_v16 }
 0x102   : > { %v1955_v27 = vpop.f32.mrb[8].mxu0  ;;  %2037 = vtanh.bf16 %v623_v24 }
 0x103   : > { %v517_v28 = vpop.f32.mrb[9].mxu0  ;;  %v1971_v29 = vpop.f32.mrb[8].mxu1  ;;  %v526_v32 = vadd.f32 %v1955_v27, %v2404_v51  ;;  %2039 = vtanh.bf16 %v614_v25 }
 0x104   : > { %v2028_v30 = vpop.eup %2027  ;;  %v1956_v33 = vpop.f32.mrb[10].mxu0  ;;  %v590_v46 = vadd.f32 %v1971_v29, %v2404_v51  ;;  %v2434_v49 = vadd.f32 %v2404_v51, %v517_v28  ;;  %2041 = vtanh.bf16 %v622_v26 }
 0x105   : > { %v581_v34 = vpop.f32.mrb[9].mxu1  ;;  %v2030_v35 = vpop.eup %2029  ;;  %v646_v36 = vunpack.c.l.bf16 %v2028_v30  ;;  %v647_v37 = vunpack.c.h.bf16 %v2028_v30  ;;  %v529_v38 = vadd.f32 %v1956_v33, %v2404_v51 }
 0x106   : > { %v1972_v39 = vpop.f32.mrb[10].mxu1  ;;  %v520_v40 = vpop.f32.mrb[11].mxu0  ;;  %v662_v42 = vunpack.c.l.bf16 %v2030_v35  ;;  %v663_v55 = vunpack.c.h.bf16 %v2030_v35  ;;  %v2444_v60 = vadd.f32 %v2404_v51, %v581_v34 }
 0x107   : > { %v2032_v41 = vpop.eup %2031  ;;  %v584_v43 = vpop.f32.mrb[11].mxu1  ;;  %v684_v44 = vmul.f32 %v2425_v31, %v646_v36  ;;  %v593_v47 = vadd.f32 %v1972_v39, %v2404_v51  ;;  %v617_v50 = vpack.c.bf16 %v529_v38, %v526_v32  ;;  %v2437_v52 = vadd.f32 %v2404_v51, %v520_v40 }
 0x108   : > { %v644_v45 = vunpack.c.l.bf16 %v2032_v41  ;;  %v700_v48 = vmul.f32 %v2425_v31, %v662_v42  ;;  %v685_v54 = vmul.f32 %v2425_v31, %v647_v37  ;;  %v2034_v56 = vpop.eup %2033  ;;  %v645_v59 = vunpack.c.h.bf16 %v2032_v41 }
 0x109   : > { %v720_v53 = vsel %vm402_vm0, %v684_v44, 0.0  ;;  %v625_v62 = vpack.c.bf16 %v593_v47, %v590_v46  ;;  %v616_v2 = vpack.c.bf16 %v2437_v52, %v2434_v49  ;;  %v2449_v3 = vadd.f32 %v2404_v51, %v584_v43 }
 0x10a   : > { %v768_v57 = vsel %vm402_vm0, %v700_v48, 0.0  ;;  %721 = vadd.xlane.f32.xlu1 %v720_v53  ;;  %v682_v58 = vmul.f32 %v2425_v31, %v644_v45  ;;  %v1959_v61 = vpop.f32.mrb[12].mxu0  ;;  %v723_v6 = vsel %vm402_vm0, %v685_v54, 0.0  ;;  %v701_v7 = vmul.f32 %v2425_v31, %v663_v55 }
 0x10b   : > { %769 = vadd.xlane.f32.xlu0 %v768_v57  ;;  %v533_v63 = vpop.f32.mrb[13].mxu0  ;;  %v1975_v0 = vpop.f32.mrb[12].mxu1  ;;  %v661_v8 = vunpack.c.h.bf16 %v2034_v56  ;;  %v683_v12 = vmul.f32 %v2425_v31, %v645_v59  ;;  %v660_v13 = vunpack.c.l.bf16 %v2034_v56  ;;  %v624_v14 = vpack.c.bf16 %v2449_v3, %v2444_v60 }
 0x10c   : > { %v2036_v1 = vpop.eup %2035  ;;  %v1960_v4 = vpop.f32.mrb[14].mxu0  ;;  %v714_v11 = vsel %vm402_vm0, %v682_v58, 0.0  ;;  %v542_v19 = vadd.f32 %v1959_v61, %v2404_v51  ;;  %v771_v20 = vsel %vm402_vm0, %v701_v7, 0.0  ;;  %2043 = vtanh.bf16 %v617_v50 }
 0x10d   : > { %v597_v5 = vpop.f32.mrb[13].mxu1  ;;  %v536_v9 = vpop.f32.mrb[15].mxu0  ;;  %v651_v16 = vunpack.c.h.bf16 %v2036_v1  ;;  %v650_v18 = vunpack.c.l.bf16 %v2036_v1  ;;  %v699_v21 = vmul.f32 %v2425_v31, %v661_v8  ;;  %v534_v22 = vadd.f32 %v2404_v51, %v533_v63 }
 0x10e   : > { %v1976_v10 = vpop.f32.mrb[14].mxu1  ;;  %724 = vadd.xlane.f32.xlu1 %v723_v6  ;;  %v2038_v17 = vpop.eup %2037  ;;  %v717_v23 = vsel %vm402_vm0, %v683_v12, 0.0  ;;  %v698_v24 = vmul.f32 %v2425_v31, %v660_v13  ;;  %v545_v25 = vadd.f32 %v1960_v4, %v2404_v51  ;;  %v537_v29 = vadd.f32 %v2404_v51, %v536_v9 }
 0x10f   : > { %v600_v15 = vpop.f32.mrb[15].mxu1  ;;  %715 = vadd.xlane.f32.xlu0 %v714_v11  ;;  %v689_v26 = vmul.f32 %v2425_v31, %v651_v16  ;;  %v667_v27 = vunpack.c.h.bf16 %v2038_v17  ;;  %v666_v28 = vunpack.c.l.bf16 %v2038_v17  ;;  %v688_v30 = vmul.f32 %v2425_v31, %v650_v18  ;;  %v2040_v38 = vpop.eup %2039 }
 0x110   : > { %v619_v32 = vpack.c.bf16 %v545_v25, %v542_v19  ;;  %v2468_v33 = vadd.f32 %v1975_v0, %v2404_v51  ;;  %v598_v34 = vadd.f32 %v2404_v51, %v597_v5  ;;  %v765_v35 = vsel %vm402_vm0, %v699_v21, 0.0  ;;  %v2042_v44 = vpop.eup %2041 }
 0x111   : > { %2045 = vtanh.bf16 %v625_v62  ;;  %v618_v36 = vpack.c.bf16 %v537_v29, %v534_v22  ;;  %v2473_v37 = vadd.f32 %v1976_v10, %v2404_v51  ;;  %v762_v39 = vsel %vm402_vm0, %v698_v24, 0.0 }
 0x112   : > { %772 = vadd.xlane.f32.xlu1 %v771_v20  ;;  %v601_v40 = vadd.f32 %v2404_v51, %v600_v15  ;;  %v735_v41 = vsel %vm402_vm0, %v689_v26, 0.0  ;;  %v705_v42 = vmul.f32 %v2425_v31, %v667_v27  ;;  %v732_v45 = vsel %vm402_vm0, %v688_v30, 0.0 }
 0x113   : > { %718 = vadd.xlane.f32.xlu0 %v717_v23  ;;  %v627_v43 = vpack.c.bf16 %v2473_v37, %v2468_v33  ;;  %v704_v46 = vmul.f32 %v2425_v31, %v666_v28  ;;  %2047 = vtanh.bf16 %v616_v2  ;;  %v649_v48 = vunpack.c.h.bf16 %v2040_v38 }
 0x114   : > { %v626_v47 = vpack.c.bf16 %v601_v40, %v598_v34  ;;  %v648_v49 = vunpack.c.l.bf16 %v2040_v38  ;;  %v783_v51 = vsel %vm402_vm0, %v705_v42, 0.0  ;;  %v665_v50 = vunpack.c.h.bf16 %v2042_v44 }
 0x115   : > { %v780_v53 = vsel %vm402_vm0, %v704_v46, 0.0  ;;  %v664_v54 = vunpack.c.l.bf16 %v2042_v44  ;;  %2049 = vtanh.bf16 %v624_v14  ;;  %v687_v55 = vmul.f32 %v2425_v31, %v649_v48 }
 0x116   : > { %766 = vadd.xlane.f32.xlu1 %v765_v35  ;;  %v686_v56 = vmul.f32 %v2425_v31, %v648_v49  ;;  %v703_v57 = vmul.f32 %v2425_v31, %v665_v50  ;;  %2051 = vtanh.bf16 %v619_v32 }
 0x117   : > { %763 = vadd.xlane.f32.xlu0 %v762_v39  ;;  %v2044_v52 = vpop.eup %2043  ;;  %v702_v60 = vmul.f32 %v2425_v31, %v664_v54  ;;  %v729_v62 = vsel %vm402_vm0, %v687_v55, 0.0  ;;  %2053 = vtanh.bf16 %v618_v36  ;;  %v2251_v55 = vmov 0  }
 0x118   : > { %v655_v58 = vunpack.c.h.bf16 %v2044_v52  ;;  %v654_v61 = vunpack.c.l.bf16 %v2044_v52  ;;  %v726_v63 = vsel %vm402_vm0, %v686_v56, 0.0  ;;  %v777_v0 = vsel %vm402_vm0, %v703_v57, 0.0  ;;  %2023 = vset.pattern.permute.xlu1 %v2251_v55  ;;  %2024 = vset.pattern.permute.xlu0 %v2251_v55  ;;  %v332_v56 = vld [vmem:[%s2529_s9 + $0x10] sm:$0xff]  ;;  %v2536_v57 = vld [vmem:[%s2529_s9 + $0x18] sm:$0xff]  ;;  %v2647_v55 = vld [vmem:[%s2529_s9 + $0xc0] sm:$0xff] }
 0x119   : > { %v774_v4 = vsel %vm402_vm0, %v702_v60, 0.0  ;;  %2055 = vtanh.bf16 %v626_v47  ;;  %v2543_v60 = vld [vmem:[%s2529_s9 + $0x98] sm:$0xff] }
 0x11a   : > { %736 = vadd.xlane.f32.xlu1 %v735_v41  ;;  %v693_v1 = vmul.f32 %v2425_v31, %v655_v58  ;;  %v692_v5 = vmul.f32 %v2425_v31, %v654_v61  ;;  %2057 = vtanh.bf16 %v627_v43  ;;  %v2539_v58 = vld [vmem:[%s2529_s9] sm:$0xff]  ;;  %v844_v61 = vsub.f32 1.0, %v332_v56 }
 0x11b   : > { %733 = vadd.xlane.f32.xlu0 %v732_v45 }
 0x11c   : > { %v2046_v59 = vpop.eup %2045  ;;  %v747_v7 = vsel %vm402_vm0, %v693_v1, 0.0  ;;  %v744_v11 = vsel %vm402_vm0, %v692_v5, 0.0  ;;  %v842_v1 = vsub.f32 1.0, %v2539_v58  ;;  %v2561_v5 = vld [vmem:[%s2529_s9 + $0x30] sm:$0xff] }
 0x11d   : > { %v671_v2 = vunpack.c.h.bf16 %v2046_v59  ;;  %v670_v6 = vunpack.c.l.bf16 %v2046_v59 }
 0x11e   : > { %784 = vadd.xlane.f32.xlu1 %v783_v51  ;;  %v2048_v3 = vpop.eup %2047 }
 0x11f   : > { %781 = vadd.xlane.f32.xlu0 %v780_v53  ;;  %v709_v8 = vmul.f32 %v2425_v31, %v671_v2  ;;  %v653_v9 = vunpack.c.h.bf16 %v2048_v3  ;;  %v708_v12 = vmul.f32 %v2425_v31, %v670_v6  ;;  %v652_v13 = vunpack.c.l.bf16 %v2048_v3  ;;  %v2554_v2 = vld [vmem:[%s2529_s9 + $0x80] sm:$0xff] }
 0x120   : > { %v2050_v10 = vpop.eup %2049  ;;  %v861_v3 = vsub.f32 1.0, %v2543_v60 }
 0x121   : > { %v795_v14 = vsel %vm402_vm0, %v709_v8, 0.0  ;;  %v691_v15 = vmul.f32 %v2425_v31, %v653_v9  ;;  %v669_v16 = vunpack.c.h.bf16 %v2050_v10  ;;  %v2052_v17 = vpop.eup %2051  ;;  %v792_v18 = vsel %vm402_vm0, %v708_v12, 0.0  ;;  %v2568_v9 = vld [vmem:[%s2529_s9 + $0xb8] sm:$0xff] }
 0x122   : > { %730 = vadd.xlane.f32.xlu1 %v729_v62  ;;  %v690_v19 = vmul.f32 %v2425_v31, %v652_v13  ;;  %v668_v20 = vunpack.c.l.bf16 %v2050_v10  ;;  %v659_v23 = vunpack.c.h.bf16 %v2052_v17  ;;  %v2054_v24 = vpop.eup %2053  ;;  %v658_v27 = vunpack.c.l.bf16 %v2052_v17  ;;  %v2571_v10 = vld [vmem:[%s2529_s9 + $0xb0] sm:$0xff] }
 0x123   : > { %727 = vadd.xlane.f32.xlu0 %v726_v63  ;;  %v741_v21 = vsel %vm402_vm0, %v691_v15, 0.0  ;;  %v707_v22 = vmul.f32 %v2425_v31, %v669_v16  ;;  %v657_v30 = vunpack.c.h.bf16 %v2054_v24  ;;  %v656_v35 = vunpack.c.l.bf16 %v2054_v24  ;;  %v2547_v63 = vld [vmem:[%s2529_s9 + $0x8] sm:$0xff] }
 0x124   : > { %v738_v25 = vsel %vm402_vm0, %v690_v19, 0.0  ;;  %v706_v26 = vmul.f32 %v2425_v31, %v668_v20  ;;  %v697_v29 = vmul.f32 %v2425_v31, %v659_v23  ;;  %v2056_v32 = vpop.eup %2055  ;;  %v696_v34 = vmul.f32 %v2425_v31, %v658_v27  ;;  %v2585_v19 = vld [vmem:[%s2529_s9 + $0xa8] sm:$0xff]  ;;  %v2592_v23 = vld [vmem:[%s2529_s9 + $0xa0] sm:$0xff]  ;;  %v2600_v27 = vld [vmem:[%s2529_s9 + $0x58] sm:$0xff] }
 0x125   : > { %v789_v28 = vsel %vm402_vm0, %v707_v22, 0.0  ;;  %v695_v37 = vmul.f32 %v2425_v31, %v657_v30  ;;  %v673_v38 = vunpack.c.h.bf16 %v2056_v32  ;;  %v2058_v39 = vpop.eup %2057  ;;  %v694_v41 = vmul.f32 %v2425_v31, %v656_v35 }
 0x126   : > { %778 = vadd.xlane.f32.xlu1 %v777_v0  ;;  %v786_v33 = vsel %vm402_vm0, %v706_v26, 0.0  ;;  %v759_v36 = vsel %vm402_vm0, %v697_v29, 0.0  ;;  %v756_v40 = vsel %vm402_vm0, %v696_v34, 0.0  ;;  %v672_v42 = vunpack.c.l.bf16 %v2056_v32  ;;  %v2550_v0 = vld [vmem:[%s2529_s9 + $0x88] sm:$0xff]  ;;  %v2607_v32 = vld [vmem:[%s2529_s9 + $0x50] sm:$0xff] }
 0x127   : > { %775 = vadd.xlane.f32.xlu0 %v774_v4  ;;  %v753_v43 = vsel %vm402_vm0, %v695_v37, 0.0  ;;  %v711_v44 = vmul.f32 %v2425_v31, %v673_v38  ;;  %v675_v45 = vunpack.c.h.bf16 %v2058_v39  ;;  %v750_v46 = vsel %vm402_vm0, %v694_v41, 0.0  ;;  %v2558_v4 = vld [vmem:[%s2529_s9 + $0x38] sm:$0xff]  ;;  %v2618_v37 = vld [vmem:[%s2529_s9 + $0xd0] sm:$0xff] }
 0x128   : > { %v710_v47 = vmul.f32 %v2425_v31, %v672_v42  ;;  %v674_v48 = vunpack.c.l.bf16 %v2058_v39  ;;  %v845_v62 = vsub.f32 1.0, %v2536_v57  ;;  %v859_v8 = vsub.f32 1.0, %v2550_v0  ;;  %v2626_v42 = vld [vmem:[%s2529_s9 + $0x48] sm:$0xff] }
 0x129   : > { %v801_v49 = vsel %vm402_vm0, %v711_v44, 0.0  ;;  %v713_v51 = vmul.f32 %v2425_v31, %v675_v45  ;;  %v858_v13 = vsub.f32 1.0, %v2554_v2  ;;  %v2577_v15 = vmul.f32 -1e+30, %v842_v1 }
 0x12a   : > { %748 = vadd.xlane.f32.xlu1 %v747_v7  ;;  %v798_v50 = vsel %vm402_vm0, %v710_v47, 0.0  ;;  %v712_v52 = vmul.f32 %v2425_v31, %v674_v48  ;;  %v2532_v31 = vld [vmem:[%s2529_s9 + $0x90] sm:$0xff]  ;;  %v843_v7 = vsub.f32 1.0, %v2547_v63  ;;  %v877_v12 = vmul.f32 -1e+30, %v845_v62  ;;  %v2633_v48 = vld [vmem:[%s2529_s9 + $0x40] sm:$0xff] }
 0x12b   : > { %745 = vadd.xlane.f32.xlu0 %v744_v11  ;;  %v807_v53 = vsel %vm402_vm0, %v713_v51, 0.0  ;;  %v860_v59 = vsub.f32 1.0, %v2532_v31  ;;  %v876_v11 = vmul.f32 -1e+30, %v844_v61  ;;  %v849_v16 = vsub.f32 1.0, %v2558_v4 }
 0x12c   : > { %v804_v54 = vsel %vm402_vm0, %v712_v52, 0.0  ;;  %v848_v17 = vsub.f32 1.0, %v2561_v5  ;;  %v2587_v20 = vmul.f32 -1e+30, %v861_v3  ;;  %v864_v22 = vsub.f32 1.0, %v2571_v10 }
 0x12d   : > { %v2563_v6 = vmul.f32 -1e+30, %v860_v59  ;;  %v2594_v24 = vmul.f32 -1e+30, %v843_v7  ;;  %v863_v30 = vsub.f32 1.0, %v2585_v19  ;;  %v853_v41 = vsub.f32 1.0, %v2600_v27 }
 0x12e   : > { %796 = vadd.xlane.f32.xlu1 %v795_v14  ;;  %v2575_v14 = vld [vmem:[%s2529_s9 + $0x28] sm:$0xff]  ;;  %v2612_v34 = vmul.f32 -1e+30, %v849_v16  ;;  %v2614_v35 = vmul.f32 -1e+30, %v848_v17  ;;  %v868_v52 = vsub.f32 1.0, %v2618_v37 }
 0x12f   : > { %793 = vadd.xlane.f32.xlu0 %v792_v18  ;;  %v2582_v18 = vld [vmem:[%s2529_s9 + $0x20] sm:$0xff]  ;;  %v847_v26 = vsub.f32 1.0, %v2575_v14  ;;  %v2653_v62 = vmul.f32 -1e+30, %v853_v41  ;;  %v850_v1 = vsub.f32 1.0, %v2633_v48  ;;  %v2658_v7 = vld [vmem:[%s2529_s9 + $0x70] sm:$0xff] }
 0x130   : > { %v846_v29 = vsub.f32 1.0, %v2582_v18  ;;  %3429 = vst [vmem:[#allocation5_spill] sm:$0xff] %v2658_v7 }
 0x131   : > { %v2628_v45 = vmul.f32 -1e+30, %v847_v26 }
 0x132   : > { %742 = vadd.xlane.f32.xlu1 %v741_v21  ;;  %v865_v21 = vsub.f32 1.0, %v2568_v9  ;;  %v2638_v51 = vmul.f32 -1e+30, %v846_v29  ;;  %v2674_v29 = vmul.f32 -1e+30, %v868_v52  ;;  %v2693_v52 = vld [vmem:[%s2529_s9 + $0xe8] sm:$0xff] }
 0x133   : > { %739 = vadd.xlane.f32.xlu0 %v738_v25  ;;  %v2596_v25 = vmul.f32 -1e+30, %v859_v8  ;;  %v2661_v8 = vld [vmem:[%s2529_s9 + $0x68] sm:$0xff]  ;;  %3432 = vst [vmem:[#allocation8_spill] sm:$0xff] %v2693_v52 }
 0x134   : > { %v2620_v39 = vmul.f32 -1e+30, %v865_v21  ;;  %3430 = vst [vmem:[#allocation6_spill] sm:$0xff] %v2661_v8  ;;  %v855_v41 = vsub.f32 1.0, %v2661_v8 }
 0x136   : > { %790 = vadd.xlane.f32.xlu1 %v789_v28  ;;  %v2602_v28 = vmul.f32 -1e+30, %v858_v13 }
 0x137   : > { %787 = vadd.xlane.f32.xlu0 %v786_v33  ;;  %v2610_v33 = vld [vmem:[%s2529_s9 + $0xd8] sm:$0xff] }
 0x138   : > { %v869_v47 = vsub.f32 1.0, %v2610_v33 }
 0x13a   : > { %760 = vadd.xlane.f32.xlu1 %v759_v36  ;;  %v862_v36 = vsub.f32 1.0, %v2592_v23 }
 0x13b   : > { %757 = vadd.xlane.f32.xlu0 %v756_v40  ;;  %v2622_v40 = vmul.f32 -1e+30, %v864_v22  ;;  %v2671_v22 = vld [vmem:[%s2529_s9 + $0x60] sm:$0xff] }
 0x13c   : > { %3431 = vst [vmem:[#allocation7_spill] sm:$0xff] %v2671_v22 }
 0x13e   : > { %754 = vadd.xlane.f32.xlu1 %v753_v43 }
 0x13f   : > { %751 = vadd.xlane.f32.xlu0 %v750_v46  ;;  %v852_v46 = vsub.f32 1.0, %v2607_v32 }
 0x141   : > { %v2666_v21 = vmul.f32 -1e+30, %v852_v46 }
 0x142   : > { %802 = vadd.xlane.f32.xlu1 %v801_v49  ;;  %v2636_v49 = vld [vmem:[%s2529_s9 + $0xc8] sm:$0xff] }
 0x143   : > { %799 = vadd.xlane.f32.xlu0 %v798_v50  ;;  %v2640_v50 = vmul.f32 -1e+30, %v863_v30  ;;  %v867_v3 = vsub.f32 1.0, %v2636_v49  ;;  %v866_v30 = vsub.f32 1.0, %v2647_v55 }
 0x145   : > { %v2689_v46 = vmul.f32 -1e+30, %v867_v3 }
 0x146   : > { %808 = vadd.xlane.f32.xlu1 %v807_v53  ;;  %v2643_v53 = vmul.f32 -1e+30, %v862_v36 }
 0x147   : > { %805 = vadd.xlane.f32.xlu0 %v804_v54  ;;  %v851_v54 = vsub.f32 1.0, %v2626_v42 }
 0x197   : > { %v722_v38 = vpop.xlane.xlu1 %721 }
 0x198   : > { %v770_v43 = vpop.xlane.xlu0 %769  ;;  %v812_v44 = vmul.f32 %v722_v38, %v332_v56  ;;  %v2650_v56 = vld [vmem:[%s2529_s9 + $0x78] sm:$0xff]  ;;  %v856_v38 = vsub.f32 1.0, %v2658_v7 }
 0x199   : > { %v828_v59 = vmul.f32 %v770_v43, %v2532_v31  ;;  %v2668_v31 = vmul.f32 -1e+30, %v869_v47  ;;  %v857_v36 = vsub.f32 1.0, %v2650_v56  ;;  %v854_v47 = vsub.f32 1.0, %v2671_v22 }
 0x19a   : > { %v2663_v13 = vadd.f32 %v876_v11, %v812_v44  ;;  %v2714_v7 = vmul.f32 -1e+30, %v856_v38 }
 0x19b   : > { %v725_v61 = vpop.xlane.xlu1 %724  ;;  %v2685_v43 = vadd.f32 %v2563_v6, %v828_v59  ;;  %v2709_v22 = vmul.f32 -1e+30, %v857_v36  ;;  %v2726_v36 = vld [vmem:[%s2529_s9 + $0xf8] sm:$0xff] }
 0x19c   : > { %v813_v16 = vmul.f32 %v725_v61, %v2536_v57  ;;  %v716_v17 = vpop.xlane.xlu0 %715  ;;  %v2680_v57 = vmul.f32 -1e+30, %v851_v54  ;;  %3436 = vst [vmem:[#allocation12_spill] sm:$0xff] %v2714_v7  ;;  %3439 = vst [vmem:[#allocation15_spill] sm:$0xff] %v2726_v36  ;;  %v873_v7 = vsub.f32 1.0, %v2726_v36 }
 0x19d   : > { %v810_v26 = vmul.f32 %v716_v17, %v2539_v58  ;;  %v2687_v58 = vmul.f32 -1e+30, %v850_v1  ;;  %v2704_v1 = vld [vmem:[%s2529_s9 + $0xe0] sm:$0xff]  ;;  %v2707_v17 = vmul.f32 -1e+30, %v866_v30  ;;  %3435 = vst [vmem:[#allocation11_spill] sm:$0xff] %v2709_v22 }
 0x19e   : > { %v2678_v11 = vadd.f32 %v877_v12, %v813_v16  ;;  %v948_v12 = vsel %vm938_vm1, %v2663_v13, -inf  ;;  %3433 = vst [vmem:[#allocation9_spill] sm:$0xff] %v2704_v1  ;;  %v870_v30 = vsub.f32 1.0, %v2704_v1  ;;  %v2762_v36 = vmul.f32 -1e+30, %v873_v7 }
 0x19f   : > { %v773_v44 = vpop.xlane.xlu1 %772  ;;  %v2700_v61 = vadd.f32 %v2577_v15, %v810_v26  ;;  %3434 = vst [vmem:[#allocation10_spill] sm:$0xff] %v2707_v17  ;;  %v2716_v15 = vmul.f32 -1e+30, %v855_v41 }
 0x1a0   : > { %v949_v54 = vsel %vm938_vm1, %v2678_v11, -inf  ;;  %v829_v6 = vmul.f32 %v773_v44, %v2543_v60  ;;  %v719_v59 = vpop.xlane.xlu0 %718  ;;  %v871_v60 = vsub.f32 1.0, %v2693_v52 }
 0x1a1   : > { %v950_v3 = vmax.f32 %v948_v12, %v949_v54  ;;  %v811_v16 = vmul.f32 %v719_v59, %v2547_v63  ;;  %3437 = vst [vmem:[#allocation13_spill] sm:$0xff] %v2716_v15  ;;  %v2722_v63 = vmul.f32 -1e+30, %v854_v47  ;;  %v939_v38 = vsel %vm938_vm1, %v2700_v61, -inf }
 0x1a2   : > { %v2712_v8 = vadd.f32 %v2587_v20, %v829_v6  ;;  %v1020_v20 = vsel %vm938_vm1, %v2685_v43, -inf  ;;  %v2736_v6 = vld [vmem:[%s2529_s9 + $0xf0] sm:$0xff]  ;;  %v2744_v15 = vmul.f32 -1e+30, %v871_v60  ;;  %s2193_s9 = scalar_lea.vmem %s2192_s29, 512 }
 0x1a3   : > { %v951_v26 = vrot.slane %v950_v3, 4  ;;  %v2720_v44 = vadd.f32 %v2594_v24, %v811_v16  ;;  %v767_v12 = vpop.xlane.xlu1 %766  ;;  %3438 = vst [vmem:[#allocation14_spill] sm:$0xff] %v2722_v63  ;;  %3440 = vst [vmem:[#allocation16_spill] sm:$0xff] %v2736_v6 }
 0x1a4   : > { %v1021_v41 = vsel %vm938_vm1, %v2712_v8, -inf  ;;  %v827_v54 = vmul.f32 %v767_v12, %v2550_v0  ;;  %v764_v24 = vpop.xlane.xlu0 %763  ;;  %3441 = vst [vmem:[#allocation17_spill] sm:$0xff] %v2744_v15 }
 0x1a5   : > { %v952_v47 = vmax.f32 %v950_v3, %v951_v26  ;;  %v1022_v59 = vmax.f32 %v1020_v20, %v1021_v41  ;;  %v940_v16 = vsel %vm938_vm1, %v2720_v44, -inf  ;;  %v826_v1 = vmul.f32 %v764_v24, %v2554_v2 }
 0x1a6   : > { %v941_v63 = vmax.f32 %v939_v38, %v940_v16  ;;  %v2742_v52 = vadd.f32 %v2596_v25, %v827_v54  ;;  %v872_v26 = vsub.f32 1.0, %v2736_v6  ;;  %v2754_v41 = vmul.f32 -1e+30, %v870_v30 }
 0x1a7   : > { %v953_v22 = vrot.slane %v952_v47, 2  ;;  %v1023_v0 = vrot.slane %v1022_v59, 4  ;;  %v2748_v12 = vadd.f32 %v2602_v28, %v826_v1  ;;  %v737_v3 = vpop.xlane.xlu1 %736 }
 0x1a8   : > { %v942_v20 = vrot.slane %v941_v63, 4  ;;  %v1012_v2 = vsel %vm938_vm1, %v2742_v52, -inf  ;;  %v817_v38 = vmul.f32 %v737_v3, %v2558_v4  ;;  %v734_v25 = vpop.xlane.xlu0 %733 }
 0x1a9   : > { %v954_v60 = vmax.f32 %v952_v47, %v953_v22  ;;  %v1024_v54 = vmax.f32 %v1022_v59, %v1023_v0  ;;  %v1011_v24 = vsel %vm938_vm1, %v2748_v12, -inf  ;;  %v816_v28 = vmul.f32 %v734_v25, %v2561_v5 }
 0x1aa   : > { %v943_v1 = vmax.f32 %v941_v63, %v942_v20  ;;  %v1013_v16 = vmax.f32 %v1011_v24, %v1012_v2  ;;  %v2760_v6 = vadd.f32 %v2612_v34, %v817_v38  ;;  %v2767_v22 = vmul.f32 -1e+30, %v872_v26 }
 0x1ab   : > { %v955_v15 = vrot.slane %v954_v60, 1  ;;  %v1025_v17 = vrot.slane %v1024_v54, 2  ;;  %v2765_v4 = vadd.f32 %v2614_v35, %v816_v28  ;;  %v785_v30 = vpop.xlane.xlu1 %784 }
 0x1ac   : > { %v944_v47 = vrot.slane %v943_v1, 2  ;;  %v1014_v59 = vrot.slane %v1013_v16, 4  ;;  %v967_v5 = vsel %vm938_vm1, %v2760_v6, -inf  ;;  %v833_v63 = vmul.f32 %v785_v30, %v2568_v9  ;;  %v782_v0 = vpop.xlane.xlu0 %781 }
 0x1ad   : > { %v956_v34 = vmax.f32 %v954_v60, %v955_v15  ;;  %v1026_v3 = vmax.f32 %v1024_v54, %v1025_v17  ;;  %v966_v7 = vsel %vm938_vm1, %v2765_v4, -inf  ;;  %v832_v20 = vmul.f32 %v782_v0, %v2571_v10 }
 0x1ae   : > { %v945_v35 = vmax.f32 %v943_v1, %v944_v47  ;;  %v1015_v2 = vmax.f32 %v1013_v16, %v1014_v59  ;;  %v968_v38 = vmax.f32 %v966_v7, %v967_v5  ;;  %v2776_v26 = vadd.f32 %v2620_v39, %v833_v63 }
 0x1af   : > { %v1085_v25 = vsub.f32 %v2663_v13, %v956_v34  ;;  %v1086_v24 = vsub.f32 %v2678_v11, %v956_v34  ;;  %v1027_v28 = vrot.slane %v1026_v3, 1  ;;  %v2781_v9 = vadd.f32 %v2622_v40, %v832_v20  ;;  %v731_v17 = vpop.xlane.xlu1 %730 }
 0x1b0   : > { %v946_v15 = vrot.slane %v945_v35, 1  ;;  %v1016_v60 = vrot.slane %v1015_v2, 2  ;;  %v969_v54 = vrot.slane %v968_v38, 4  ;;  %v1039_v10 = vsel %vm938_vm1, %v2776_v26, -inf  ;;  %v728_v1 = vpop.xlane.xlu0 %727 }
 0x1b1   : > { %v1119_v16 = vmul.f32 1.442695, %v1085_v25  ;;  %v1121_v30 = vmul.f32 1.442695, %v1086_v24  ;;  %v1028_v39 = vmax.f32 %v1026_v3, %v1027_v28  ;;  %v1038_v13 = vsel %vm938_vm1, %v2781_v9, -inf }
 0x1b2   : > { %v947_v47 = vmax.f32 %v945_v35, %v946_v15  ;;  %v1017_v11 = vmax.f32 %v1015_v2, %v1016_v60  ;;  %v970_v59 = vmax.f32 %v968_v38, %v969_v54  ;;  %v1040_v5 = vmax.f32 %v1038_v13, %v1039_v10 }
 0x1b3   : > { %2059 = vpow2.f32 %v1119_v16  ;;  %v1101_v40 = vsub.f32 %v2685_v43, %v1028_v39  ;;  %v1102_v63 = vsub.f32 %v2712_v8, %v1028_v39  ;;  %v815_v0 = vmul.f32 %v731_v17, %v2575_v14  ;;  %v779_v34 = vpop.xlane.xlu1 %778 }
 0x1b4   : > { %2061 = vpow2.f32 %v1121_v30  ;;  %v1083_v7 = vsub.f32 %v2700_v61, %v947_v47  ;;  %v1084_v3 = vsub.f32 %v2720_v44, %v947_v47  ;;  %v1018_v20 = vrot.slane %v1017_v11, 1  ;;  %v776_v25 = vpop.xlane.xlu0 %775 }
 0x1b5   : > { %v1151_v24 = vmul.f32 1.442695, %v1101_v40  ;;  %v1153_v35 = vmul.f32 1.442695, %v1102_v63  ;;  %v971_v2 = vrot.slane %v970_v59, 2  ;;  %v1041_v38 = vrot.slane %v1040_v5, 4 }
 0x1b6   : > { %v1115_v28 = vmul.f32 1.442695, %v1083_v7  ;;  %v1117_v15 = vmul.f32 1.442695, %v1084_v3  ;;  %v1019_v60 = vmax.f32 %v1017_v11, %v1018_v20  ;;  %v2793_v43 = vadd.f32 %v2628_v45, %v815_v0 }
 0x1b7   : > { %2063 = vpow2.f32 %v1151_v24  ;;  %v972_v14 = vmax.f32 %v970_v59, %v971_v2  ;;  %v1042_v8 = vmax.f32 %v1040_v5, %v1041_v38  ;;  %v814_v17 = vmul.f32 %v728_v1, %v2582_v18  ;;  %v749_v61 = vpop.xlane.xlu1 %748 }
 0x1b8   : > { %2065 = vpow2.f32 %v1153_v35  ;;  %v1099_v44 = vsub.f32 %v2748_v12, %v1019_v60  ;;  %v1100_v54 = vsub.f32 %v2742_v52, %v1019_v60  ;;  %v958_v10 = vsel %vm938_vm1, %v2793_v43, -inf  ;;  %v746_v16 = vpop.xlane.xlu0 %745 }
 0x1b9   : > { %2067 = vpow2.f32 %v1115_v28  ;;  %v973_v30 = vrot.slane %v972_v14, 1  ;;  %v1043_v39 = vrot.slane %v1042_v8, 2  ;;  %v2801_v45 = vadd.f32 %v2638_v51, %v814_v17 }
 0x1ba   : > { %2069 = vpow2.f32 %v1117_v15  ;;  %v1147_v13 = vmul.f32 1.442695, %v1099_v44  ;;  %v1149_v47 = vmul.f32 1.442695, %v1100_v54  ;;  %v831_v18 = vmul.f32 %v779_v34, %v2585_v19 }
 0x1bb   : > { %v974_v1 = vmax.f32 %v972_v14, %v973_v30  ;;  %v1044_v11 = vmax.f32 %v1042_v8, %v1043_v39  ;;  %v957_v52 = vsel %vm938_vm1, %v2801_v45, -inf  ;;  %v830_v12 = vmul.f32 %v776_v25, %v2592_v23  ;;  %v797_v40 = vpop.xlane.xlu1 %796 }
 0x1bc   : > { %2071 = vpow2.f32 %v1147_v13  ;;  %v959_v59 = vmax.f32 %v957_v52, %v958_v10  ;;  %v2808_v5 = vadd.f32 %v2640_v50, %v831_v18  ;;  %v821_v51 = vmul.f32 %v749_v61, %v2600_v27  ;;  %v794_v7 = vpop.xlane.xlu0 %793 }
 0x1bd   : > { %v2811_v63 = vpop.eup %2059  ;;  %2073 = vpow2.f32 %v1149_v47  ;;  %v1089_v19 = vsub.f32 %v2765_v4, %v974_v1  ;;  %v1090_v0 = vsub.f32 %v2760_v6, %v974_v1  ;;  %v1045_v34 = vrot.slane %v1044_v11, 1 }
 0x1be   : > { %v2815_v3 = vpop.eup %2061  ;;  %v1188_v23 = vsel %vm938_vm1, %v2811_v63, 0.0  ;;  %v960_v20 = vrot.slane %v959_v59, 4  ;;  %v1030_v50 = vsel %vm938_vm1, %v2808_v5, -inf  ;;  %v2822_v27 = vadd.f32 %v2643_v53, %v830_v12 }
 0x1bf   : > { %v1189_v25 = vsel %vm938_vm1, %v2815_v3, 0.0  ;;  %v1127_v4 = vmul.f32 1.442695, %v1089_v19  ;;  %v1129_v24 = vmul.f32 1.442695, %v1090_v0  ;;  %v1046_v6 = vmax.f32 %v1044_v11, %v1045_v34  ;;  %v743_v54 = vpop.xlane.xlu1 %742 }
 0x1c0   : > { %v2826_v35 = vadd.f32 %v1189_v25, %v1188_v23  ;;  %v961_v2 = vmax.f32 %v959_v59, %v960_v20  ;;  %v1029_v38 = vsel %vm938_vm1, %v2822_v27, -inf  ;;  %v2831_v28 = vadd.f32 %v2653_v62, %v821_v51 }
 0x1c1   : > { %v2833_v15 = vpop.eup %2063  ;;  %2075 = vpow2.f32 %v1127_v4  ;;  %v1105_v53 = vsub.f32 %v2781_v9, %v1046_v6  ;;  %v1106_v60 = vsub.f32 %v2776_v26, %v1046_v6  ;;  %v1031_v14 = vmax.f32 %v1029_v38, %v1030_v50  ;;  %v2846_v26 = vpop.xlane.xlu0 %739 }
 0x1c2   : > { %v2837_v8 = vpop.eup %2065  ;;  %v1191_v17 = vrot.slane %v2826_v35, 4  ;;  %v1260_v61 = vsel %vm938_vm1, %v2833_v15, 0.0  ;;  %2077 = vpow2.f32 %v1129_v24  ;;  %v962_v44 = vrot.slane %v961_v2, 2 }
 0x1c3   : > { %v2842_v62 = vpop.eup %2067  ;;  %v1261_v10 = vsel %vm938_vm1, %v2837_v8, 0.0  ;;  %v1159_v30 = vmul.f32 1.442695, %v1105_v53  ;;  %v1161_v9 = vmul.f32 1.442695, %v1106_v60  ;;  %v1032_v39 = vrot.slane %v1031_v14, 4 }
 0x1c4   : > { %v2848_v13 = vpop.eup %2069  ;;  %v2850_v47 = vadd.f32 %v1261_v10, %v1260_v61  ;;  %v1179_v18 = vsel %vm938_vm1, %v2842_v62, 0.0  ;;  %v963_v1 = vmax.f32 %v961_v2, %v962_v44  ;;  %v985_v11 = vsel %vm938_vm1, %v2831_v28, -inf  ;;  %v791_v2 = vpop.xlane.xlu1 %790 }
 0x1c5   : > { %v1180_v52 = vsel %vm938_vm1, %v2848_v13, 0.0  ;;  %2079 = vpow2.f32 %v1159_v30  ;;  %v1033_v12 = vmax.f32 %v1031_v14, %v1032_v39  ;;  %v820_v59 = vmul.f32 %v746_v16, %v2607_v32  ;;  %v788_v14 = vpop.xlane.xlu0 %787 }
 0x1c6   : > { %v2859_v51 = vpop.eup %2071  ;;  %v1263_v19 = vrot.slane %v2850_v47, 4  ;;  %v2862_v0 = vadd.f32 %v1180_v52, %v1179_v18  ;;  %2081 = vpow2.f32 %v1161_v9  ;;  %v964_v34 = vrot.slane %v963_v1, 1 }
 0x1c7   : > { %v2864_v23 = vpop.eup %2073  ;;  %v1251_v20 = vsel %vm938_vm1, %v2859_v51, 0.0  ;;  %v1034_v50 = vrot.slane %v1033_v12, 2  ;;  %v2869_v25 = vadd.f32 %v2666_v21, %v820_v59  ;;  %v837_v4 = vmul.f32 %v797_v40, %v2610_v33 }
 0x1c8   : > { %v1182_v32 = vrot.slane %v2862_v0, 4  ;;  %v1252_v16 = vsel %vm938_vm1, %v2864_v23, 0.0  ;;  %v965_v24 = vmax.f32 %v963_v1, %v964_v34  ;;  %v836_v6 = vmul.f32 %v794_v7, %v2618_v37  ;;  %v761_v59 = vpop.xlane.xlu1 %760  ;;  %v3451_v7 = vld [vmem:[#allocation9_spill] sm:$0xff] }
 0x1c9   : > { %v2876_v38 = vadd.f32 %v1252_v16, %v1251_v20  ;;  %v1035_v53 = vmax.f32 %v1033_v12, %v1034_v50  ;;  %v984_v60 = vsel %vm938_vm1, %v2869_v25, -inf  ;;  %v2881_v21 = vadd.f32 %v2668_v31, %v837_v4  ;;  %v758_v16 = vpop.xlane.xlu0 %757 }
 0x1ca   : > { %v1087_v33 = vsub.f32 %v2801_v45, %v965_v24  ;;  %v1088_v40 = vsub.f32 %v2793_v43, %v965_v24  ;;  %v986_v61 = vmax.f32 %v984_v60, %v985_v11  ;;  %v2886_v44 = vadd.f32 %v2674_v29, %v836_v6 }
 0x1cb   : > { %v2888_v37 = vpop.eup %2075  ;;  %v1036_v10 = vrot.slane %v1035_v53, 1  ;;  %v1057_v30 = vsel %vm938_vm1, %v2881_v21, -inf  ;;  %v819_v31 = vmul.f32 %v743_v54, %v2626_v42 }
 0x1cc   : > { %v2894_v9 = vpop.eup %2077  ;;  %v1206_v45 = vsel %vm938_vm1, %v2888_v37, 0.0  ;;  %v1123_v43 = vmul.f32 1.442695, %v1087_v33  ;;  %v1125_v39 = vmul.f32 1.442695, %v1088_v40  ;;  %v987_v18 = vrot.slane %v986_v61, 4 }
 0x1cd   : > { %v1207_v29 = vsel %vm938_vm1, %v2894_v9, 0.0  ;;  %v1037_v1 = vmax.f32 %v1035_v53, %v1036_v10  ;;  %v1056_v11 = vsel %vm938_vm1, %v2886_v44, -inf  ;;  %v2903_v52 = vadd.f32 %v2680_v57, %v819_v31 }
 0x1ce   : > { %v2905_v12 = vadd.f32 %v1207_v29, %v1206_v45  ;;  %2083 = vpow2.f32 %v1123_v43  ;;  %v988_v42 = vmax.f32 %v986_v61, %v987_v18  ;;  %v1058_v54 = vmax.f32 %v1056_v11, %v1057_v30 }
 0x1cf   : > { %v2907_v34 = vpop.eup %2079  ;;  %2085 = vpow2.f32 %v1125_v39  ;;  %v1103_v20 = vsub.f32 %v2822_v27, %v1037_v1  ;;  %v1104_v50 = vsub.f32 %v2808_v5, %v1037_v1  ;;  %v976_v4 = vsel %vm938_vm1, %v2903_v52, -inf }
 0x1d0   : > { %v2913_v24 = vpop.eup %2081  ;;  %v1278_v6 = vsel %vm938_vm1, %v2907_v34, 0.0  ;;  %v989_v53 = vrot.slane %v988_v42, 2  ;;  %v1059_v60 = vrot.slane %v1058_v54, 4  ;;  %v818_v5 = vmul.f32 %v2846_v26, %v2633_v48  ;;  %v755_v48 = vpop.xlane.xlu1 %754 }
 0x1d1   : > { %v1279_v33 = vsel %vm938_vm1, %v2913_v24, 0.0  ;;  %v1155_v40 = vmul.f32 1.442695, %v1103_v20  ;;  %v1157_v27 = vmul.f32 1.442695, %v1104_v50  ;;  %v835_v31 = vmul.f32 %v791_v2, %v2636_v49  ;;  %v3442_v49 = vld [vmem:[#allocation10_spill] sm:$0xff] }
 0x1d2   : > { %v2922_v61 = vadd.f32 %v1279_v33, %v1278_v6  ;;  %v990_v10 = vmax.f32 %v988_v42, %v989_v53  ;;  %v1060_v30 = vmax.f32 %v1058_v54, %v1059_v60  ;;  %v2926_v45 = vadd.f32 %v2687_v58, %v818_v5  ;;  %v3443_v58 = vld [vmem:[#allocation11_spill] sm:$0xff]  ;;  %v3445_v53 = vld [vmem:[#allocation6_spill] sm:$0xff] }
 0x1d3   : > { %2087 = vpow2.f32 %v1155_v40  ;;  %v834_v43 = vmul.f32 %v788_v14, %v2647_v55  ;;  %v825_v39 = vmul.f32 %v761_v59, %v2650_v56  ;;  %v2934_v11 = vadd.f32 %v2689_v46, %v835_v31  ;;  %v752_v55 = vpop.xlane.xlu0 %751  ;;  %v3444_v59 = vld [vmem:[#allocation5_spill] sm:$0xff]  ;;  %v3446_v31 = vld [vmem:[#allocation12_spill] sm:$0xff] }
 0x1d4   : > { %2089 = vpow2.f32 %v1157_v27  ;;  %v991_v29 = vrot.slane %v990_v10, 1  ;;  %v1061_v1 = vrot.slane %v1060_v30, 2  ;;  %v975_v26 = vsel %vm938_vm1, %v2926_v45, -inf }
 0x1d5   : > { %v2937_v2 = vadd.f32 %v3442_v49, %v834_v43  ;;  %v2940_v42 = vadd.f32 %v3443_v58, %v825_v39  ;;  %v977_v54 = vmax.f32 %v975_v26, %v976_v4  ;;  %v824_v20 = vmul.f32 %v758_v16, %v3444_v59  ;;  %v3447_v39 = vld [vmem:[#allocation13_spill] sm:$0xff]  ;;  %v803_v26 = vpop.xlane.xlu1 %802 }
 0x1d6   : > { %v992_v56 = vmax.f32 %v990_v10, %v991_v29  ;;  %v1062_v14 = vmax.f32 %v1060_v30, %v1061_v1  ;;  %v1048_v50 = vsel %vm938_vm1, %v2934_v11, -inf  ;;  %v823_v60 = vmul.f32 %v755_v48, %v3445_v53 }
 0x1d7   : > { %v1047_v6 = vsel %vm938_vm1, %v2937_v2, -inf  ;;  %v1003_v46 = vsel %vm938_vm1, %v2940_v42, -inf  ;;  %v978_v5 = vrot.slane %v977_v54, 4  ;;  %v2959_v43 = vadd.f32 %v3446_v31, %v824_v20 }
 0x1d8   : > { %v2950_v33 = vpop.eup %2083  ;;  %v1093_v40 = vsub.f32 %v2869_v25, %v992_v56  ;;  %v1094_v27 = vsub.f32 %v2831_v28, %v992_v56  ;;  %v1063_v4 = vrot.slane %v1062_v14, 1  ;;  %v1049_v30 = vmax.f32 %v1047_v6, %v1048_v50  ;;  %v800_v50 = vpop.xlane.xlu0 %799 }
 0x1d9   : > { %v2954_v16 = vpop.eup %2085  ;;  %v1197_v10 = vsel %vm938_vm1, %v2950_v33, 0.0  ;;  %v2962_v29 = vadd.f32 %v3447_v39, %v823_v60  ;;  %v979_v58 = vmax.f32 %v977_v54, %v978_v5  ;;  %v1002_v59 = vsel %vm938_vm1, %v2959_v43, -inf }
 0x1da   : > { %v1198_v1 = vsel %vm938_vm1, %v2954_v16, 0.0  ;;  %v1135_v25 = vmul.f32 1.442695, %v1093_v40  ;;  %v1137_v48 = vmul.f32 1.442695, %v1094_v27  ;;  %v1064_v28 = vmax.f32 %v1062_v14, %v1063_v4 }
 0x1db   : > { %v2966_v49 = vadd.f32 %v1198_v1, %v1197_v10  ;;  %v1050_v56 = vrot.slane %v1049_v30, 4  ;;  %v1004_v53 = vmax.f32 %v1002_v59, %v1003_v46  ;;  %v980_v14 = vrot.slane %v979_v58, 2 }
 0x1dc   : > { %2091 = vpow2.f32 %v1135_v25  ;;  %v1109_v20 = vsub.f32 %v2886_v44, %v1064_v28  ;;  %v1110_v6 = vsub.f32 %v2881_v21, %v1064_v28  ;;  %v994_v39 = vsel %vm938_vm1, %v2962_v29, -inf  ;;  %v3448_v25 = vld [vmem:[#allocation7_spill] sm:$0xff]  ;;  %v809_v28 = vpop.xlane.xlu1 %808  ;;  %v806_v40 = vpop.xlane.xlu0 %805 }
 0x1dd   : > { %v2972_v60 = vpop.eup %2087  ;;  %2093 = vpow2.f32 %v1137_v48  ;;  %v1051_v27 = vmax.f32 %v1049_v30, %v1050_v56  ;;  %v1005_v31 = vrot.slane %v1004_v53, 4  ;;  %v981_v21 = vmax.f32 %v979_v58, %v980_v14  ;;  %v3450_v14 = vld [vmem:[#allocation14_spill] sm:$0xff] }
 0x1de   : > { %v2975_v4 = vpop.eup %2089  ;;  %v1269_v54 = vsel %vm938_vm1, %v2972_v60, 0.0  ;;  %v1167_v5 = vmul.f32 1.442695, %v1109_v20  ;;  %v1169_v10 = vmul.f32 1.442695, %v1110_v6  ;;  %v822_v48 = vmul.f32 %v752_v55, %v3448_v25  ;;  %v3449_v20 = vld [vmem:[#allocation8_spill] sm:$0xff] }
 0x1df   : > { %v1270_v44 = vsel %vm938_vm1, %v2975_v4, 0.0  ;;  %v1052_v46 = vrot.slane %v1051_v27, 2  ;;  %v1006_v30 = vmax.f32 %v1004_v53, %v1005_v31  ;;  %v982_v56 = vrot.slane %v981_v21, 1  ;;  %v3452_v53 = vld [vmem:[#allocation17_spill] sm:$0xff]  ;;  %v3453_v55 = vld [vmem:[#allocation15_spill] sm:$0xff] }
 0x1e0   : > { %v2983_v1 = vadd.f32 %v1270_v44, %v1269_v54  ;;  %2095 = vpow2.f32 %v1167_v5  ;;  %v839_v6 = vmul.f32 %v803_v26, %v3449_v20  ;;  %v2989_v18 = vadd.f32 %v3450_v14, %v822_v48 }
 0x1e1   : > { %2097 = vpow2.f32 %v1169_v10  ;;  %v1053_v59 = vmax.f32 %v1051_v27, %v1052_v46  ;;  %v1007_v58 = vrot.slane %v1006_v30, 2  ;;  %v838_v54 = vmul.f32 %v800_v50, %v3451_v7  ;;  %v3454_v46 = vld [vmem:[#allocation16_spill] sm:$0xff] }
 0x1e2   : > { %v1272_v57 = vrot.slane %v2983_v1, 4  ;;  %v983_v44 = vmax.f32 %v981_v21, %v982_v56  ;;  %v2993_v31 = vadd.f32 %v3452_v53, %v839_v6  ;;  %v841_v10 = vmul.f32 %v809_v28, %v3453_v55 }
 0x1e3   : > { %v1054_v5 = vrot.slane %v1053_v59, 1  ;;  %v1008_v25 = vmax.f32 %v1006_v30, %v1007_v58  ;;  %v993_v26 = vsel %vm938_vm1, %v2989_v18, -inf  ;;  %v2999_v27 = vadd.f32 %v2754_v41, %v838_v54 }
 0x1e4   : > { %v840_v20 = vmul.f32 %v806_v40, %v3454_v46  ;;  %v1091_v48 = vsub.f32 %v2926_v45, %v983_v44  ;;  %v1092_v7 = vsub.f32 %v2903_v52, %v983_v44  ;;  %v995_v21 = vmax.f32 %v993_v26, %v994_v39 }
 0x1e5   : > { %v1055_v50 = vmax.f32 %v1053_v59, %v1054_v5  ;;  %v1009_v6 = vrot.slane %v1008_v25, 1  ;;  %v1066_v30 = vsel %vm938_vm1, %v2993_v31, -inf  ;;  %v1065_v28 = vsel %vm938_vm1, %v2999_v27, -inf }
 0x1e6   : > { %v3004_v56 = vpop.eup %2091  ;;  %v3011_v41 = vadd.f32 %v2762_v36, %v841_v10  ;;  %v1131_v52 = vmul.f32 1.442695, %v1091_v48  ;;  %v1133_v40 = vmul.f32 1.442695, %v1092_v7  ;;  %v996_v44 = vrot.slane %v995_v21, 4 }
 0x1e7   : > { %v3013_v58 = vpop.eup %2093  ;;  %v1224_v45 = vsel %vm938_vm1, %v3004_v56, 0.0  ;;  %v1107_v39 = vsub.f32 %v2937_v2, %v1055_v50  ;;  %v1108_v14 = vsub.f32 %v2934_v11, %v1055_v50  ;;  %v1010_v54 = vmax.f32 %v1008_v25, %v1009_v6 }
 0x1e8   : > { %v1225_v59 = vsel %vm938_vm1, %v3013_v58, 0.0  ;;  %2099 = vpow2.f32 %v1131_v52  ;;  %v1067_v53 = vmax.f32 %v1065_v28, %v1066_v30  ;;  %v997_v25 = vmax.f32 %v995_v21, %v996_v44 }
 0x1e9   : > { %v3021_v5 = vadd.f32 %v1225_v59, %v1224_v45  ;;  %v1163_v36 = vmul.f32 1.442695, %v1107_v39  ;;  %2101 = vpow2.f32 %v1133_v40  ;;  %v1165_v10 = vmul.f32 1.442695, %v1108_v14 }
 0x1ea   : > { %v3023_v55 = vpop.eup %2095  ;;  %v1097_v26 = vsub.f32 %v2959_v43, %v1010_v54  ;;  %v1098_v2 = vsub.f32 %v2940_v42, %v1010_v54  ;;  %v998_v43 = vrot.slane %v997_v25, 2  ;;  %v1068_v28 = vrot.slane %v1067_v53, 4 }
 0x1eb   : > { %v3027_v46 = vpop.eup %2097  ;;  %v1227_v48 = vrot.slane %v3021_v5, 4  ;;  %v1296_v11 = vsel %vm938_vm1, %v3023_v55, 0.0  ;;  %2103 = vpow2.f32 %v1163_v36  ;;  %v1075_v42 = vsel %vm938_vm1, %v3011_v41, -inf }
 0x1ec   : > { %v1297_v7 = vsel %vm938_vm1, %v3027_v46, 0.0  ;;  %2105 = vpow2.f32 %v1165_v10  ;;  %v1143_v50 = vmul.f32 1.442695, %v1097_v26  ;;  %v1145_v6 = vmul.f32 1.442695, %v1098_v2 }
 0x1ed   : > { %v3034_v30 = vadd.f32 %v1297_v7, %v1296_v11  ;;  %v3039_v45 = vadd.f32 %v2767_v22, %v840_v20  ;;  %v1192_v21 = vadd.f32 %v1191_v17, %v2826_v35  ;;  %v1264_v52 = vadd.f32 %v1263_v19, %v2850_v47 }
 0x1ee   : > { %2107 = vpow2.f32 %v1143_v50  ;;  %v999_v39 = vmax.f32 %v997_v25, %v998_v43  ;;  %v1069_v59 = vmax.f32 %v1067_v53, %v1068_v28  ;;  %v1183_v22 = vadd.f32 %v1182_v32, %v2862_v0 }
 0x1ef   : > { %v1299_v40 = vrot.slane %v3034_v30, 4  ;;  %2109 = vpow2.f32 %v1145_v6  ;;  %v1074_v14 = vsel %vm938_vm1, %v3039_v45, -inf  ;;  %v1193_v54 = vrot.slane %v1192_v21, 2 }
 0x1f0   : > { %v1265_v44 = vrot.slane %v1264_v52, 2  ;;  %v1000_v20 = vrot.slane %v999_v39, 1  ;;  %v1070_v35 = vrot.slane %v1069_v59, 2  ;;  %v1076_v17 = vmax.f32 %v1074_v14, %v1075_v42 }
 0x1f1   : > { %v3455_v47 = vrot.slane %v2876_v38, 4  ;;  %v1194_v36 = vadd.f32 %v1193_v54, %v1192_v21  ;;  %v1184_v26 = vrot.slane %v1183_v22, 2  ;;  %v3456_v53 = vrot.slane %v2922_v61, 4 }
 0x1f2   : > { %v1266_v10 = vadd.f32 %v1265_v44, %v1264_v52  ;;  %v3059_v11 = vpop.eup %2099  ;;  %v1001_v25 = vmax.f32 %v999_v39, %v1000_v20  ;;  %v1071_v7 = vmax.f32 %v1069_v59, %v1070_v35  ;;  %v1077_v50 = vrot.slane %v1076_v17, 4 }
 0x1f3   : > { %v1255_v19 = vadd.f32 %v3455_v47, %v2876_v38  ;;  %v1282_v2 = vadd.f32 %v3456_v53, %v2922_v61  ;;  %v3061_v32 = vpop.eup %2101  ;;  %v1215_v6 = vsel %vm938_vm1, %v3059_v11, 0.0  ;;  %v1195_v43 = vrot.slane %v1194_v36, 1 }
 0x1f4   : > { %v1267_v38 = vrot.slane %v1266_v10, 1  ;;  %v1185_v28 = vadd.f32 %v1184_v26, %v1183_v22  ;;  %v1216_v21 = vsel %vm938_vm1, %v3061_v32, 0.0  ;;  %v1095_v61 = vsub.f32 %v2989_v18, %v1001_v25 }
 0x1f5   : > { %v1256_v0 = vrot.slane %v1255_v19, 2  ;;  %v3065_v42 = vpop.eup %2103  ;;  %v1096_v52 = vsub.f32 %v2962_v29, %v1001_v25  ;;  %v1072_v39 = vrot.slane %v1071_v7, 1  ;;  %v3073_v14 = vadd.f32 %v1216_v21, %v1215_v6 }
 0x1f6   : > { %v3071_v59 = vpop.eup %2105  ;;  %v1287_v54 = vsel %vm938_vm1, %v3065_v42, 0.0  ;;  %v1078_v44 = vmax.f32 %v1076_v17, %v1077_v50  ;;  %v1196_v20 = vadd.f32 %v1195_v43, %v1194_v36  ;;  %v1139_v35 = vmul.f32 1.442695, %v1095_v61 }
 0x1f7   : > { %v1288_v22 = vsel %vm938_vm1, %v3071_v59, 0.0  ;;  %v1141_v47 = vmul.f32 1.442695, %v1096_v52  ;;  %v1073_v26 = vmax.f32 %v1071_v7, %v1072_v39  ;;  %v1257_v18 = vadd.f32 %v1256_v0, %v1255_v19 }
 0x1f8   : > { %v3079_v53 = vpop.eup %2107  ;;  %v3082_v29 = vadd.f32 %v1288_v22, %v1287_v54  ;;  %v1079_v25 = vrot.slane %v1078_v44, 2  ;;  %2111 = vrcp.f32 %v1196_v20  ;;  %v1268_v54 = vadd.f32 %v1267_v38, %v1266_v10 }
 0x1f9   : > { %v3084_v6 = vpop.eup %2109  ;;  %v1242_v17 = vsel %vm938_vm1, %v3079_v53, 0.0  ;;  %2113 = vpow2.f32 %v1139_v35  ;;  %v1111_v36 = vsub.f32 %v2999_v27, %v1073_v26  ;;  %v1112_v50 = vsub.f32 %v2993_v31, %v1073_v26 }
 0x1fa   : > { %v1290_v7 = vrot.slane %v3082_v29, 4  ;;  %v1243_v43 = vsel %vm938_vm1, %v3084_v6, 0.0  ;;  %2115 = vpow2.f32 %v1141_v47  ;;  %v1080_v21 = vmax.f32 %v1078_v44, %v1079_v25 }
 0x1fb   : > { %v3093_v61 = vadd.f32 %v1243_v43, %v1242_v17  ;;  %v1171_v52 = vmul.f32 1.442695, %v1111_v36  ;;  %v1173_v39 = vmul.f32 1.442695, %v1112_v50  ;;  %v1186_v22 = vrot.slane %v1185_v28, 1 }
 0x1fc   : > { %v1081_v20 = vrot.slane %v1080_v21, 1  ;;  %v1283_v35 = vrot.slane %v1282_v2, 2  ;;  %v3457_v31 = vrot.slane %v2905_v12, 4  ;;  %v1273_v44 = vadd.f32 %v1272_v57, %v2983_v1 }
 0x1fd   : > { %v1245_v27 = vrot.slane %v3093_v61, 4  ;;  %2117 = vpow2.f32 %v1171_v52  ;;  %v1187_v25 = vadd.f32 %v1186_v22, %v1185_v28  ;;  %v1258_v10 = vrot.slane %v1257_v18, 1 }
 0x1fe   : > { %v1210_v26 = vadd.f32 %v3457_v31, %v2905_v12  ;;  %2119 = vpow2.f32 %v1173_v39  ;;  %v1082_v47 = vmax.f32 %v1080_v21, %v1081_v20  ;;  %v1284_v38 = vadd.f32 %v1283_v35, %v1282_v2 }
 0x1ff   : > { %2121 = vrcp.f32 %v1268_v54  ;;  %v1274_v0 = vrot.slane %v1273_v44, 2  ;;  %v1259_v50 = vadd.f32 %v1258_v10, %v1257_v18  ;;  %v1228_v57 = vadd.f32 %v1227_v48, %v3021_v5 }
 0x200   : > { %v1211_v19 = vrot.slane %v1210_v26, 2  ;;  %v1113_v17 = vsub.f32 %v3039_v45, %v1082_v47  ;;  %v1114_v36 = vsub.f32 %v3011_v41, %v1082_v47  ;;  %2123 = vrcp.f32 %v1187_v25 }
 0x201   : > { %v1285_v12 = vrot.slane %v1284_v38, 1  ;;  %v1275_v52 = vadd.f32 %v1274_v0, %v1273_v44  ;;  %2125 = vrcp.f32 %v1259_v50  ;;  %v3458_v41 = vrot.slane %v2966_v49, 4 }
 0x202   : > { %v1212_v43 = vadd.f32 %v1211_v19, %v1210_v26  ;;  %v2112_v1 = vpop.eup %2111  ;;  %v1175_v2 = vmul.f32 1.442695, %v1113_v17  ;;  %v1177_v45 = vmul.f32 1.442695, %v1114_v36  ;;  %v1229_v35 = vrot.slane %v1228_v57, 2 }
 0x203   : > { %v1201_v28 = vadd.f32 %v3458_v41, %v2966_v49  ;;  %v3116_v18 = vpop.eup %2113  ;;  %v1341_v21 = vmul.f32 %v2112_v1, %v2811_v63  ;;  %v1342_v5 = vmul.f32 %v2112_v1, %v2815_v3  ;;  %v1286_v48 = vadd.f32 %v1285_v12, %v1284_v38 }
 0x204   : > { %v1213_v39 = vrot.slane %v1212_v43, 1  ;;  %v3120_v54 = vpop.eup %2115  ;;  %v1233_v20 = vsel %vm938_vm1, %v3116_v18, 0.0  ;;  %2127 = vpow2.f32 %v1175_v2  ;;  %v1276_v22 = vrot.slane %v1275_v52, 1 }
 0x205   : > { %v1234_v31 = vsel %vm938_vm1, %v3120_v54, 0.0  ;;  %2129 = vpow2.f32 %v1177_v45  ;;  %1726 = vst.msk [vmem:[%s3111_s12 + $0x10] sm:$0xff] %vm938_vm1, %v1341_v21  ;;  %1383 = vperm.xlu1 %2023, %v1341_v21   ;;  %1727 = vst.msk [vmem:[%s3111_s12 + $0x18] sm:$0xff] %vm938_vm1, %v1342_v5  ;;  %v1202_v3 = vrot.slane %v1201_v28, 2  ;;  %v1230_v44 = vadd.f32 %v1229_v35, %v1228_v57 }
 0x206   : > { %v1214_v63 = vadd.f32 %v1213_v39, %v1212_v43  ;;  %v1235_v49 = vadd.f32 %v1234_v31, %v1233_v20  ;;  %2131 = vrcp.f32 %v1286_v48  ;;  %v1277_v26 = vadd.f32 %v1276_v22, %v1275_v52 }
 0x207   : > { %v3130_v47 = vpop.eup %2117  ;;  %v1203_v25 = vadd.f32 %v1202_v3, %v1201_v28  ;;  %v1300_v10 = vadd.f32 %v1299_v40, %v3034_v30  ;;  %v3459_v38 = vrot.slane %v3073_v14, 4  ;;  %v1231_v50 = vrot.slane %v1230_v44, 1 }
 0x208   : > { %2133 = vrcp.f32 %v1214_v63  ;;  %v3138_v0 = vpop.eup %2119  ;;  %v1236_v17 = vrot.slane %v1235_v49, 4  ;;  %v1305_v36 = vsel %vm938_vm1, %v3130_v47, 0.0  ;;  %v1246_v63 = vadd.f32 %v1245_v27, %v3093_v61 }
 0x209   : > { %v1219_v19 = vadd.f32 %v3459_v38, %v3073_v14  ;;  %2135 = vrcp.f32 %v1277_v26  ;;  %v2122_v12 = vpop.eup %2121  ;;  %v1306_v43 = vsel %vm938_vm1, %v3138_v0, 0.0  ;;  %1388 = vperm.xlu1 %2023, %v1342_v5   ;;  %v1204_v52 = vrot.slane %v1203_v25, 1 }
 0x20a   : > { %v1301_v30 = vrot.slane %v1300_v10, 2  ;;  %v2124_v57 = vpop.eup %2123  ;;  %v1307_v14 = vadd.f32 %v1306_v43, %v1305_v36  ;;  %v1358_v1 = vmul.f32 %v2122_v12, %v2837_v8  ;;  %v1357_v2 = vmul.f32 %v2122_v12, %v2833_v15 }
 0x20b   : > { %v1220_v40 = vrot.slane %v1219_v19, 2  ;;  %v1232_v45 = vadd.f32 %v1231_v50, %v1230_v44  ;;  %v1339_v41 = vmul.f32 %v2124_v57, %v2842_v62  ;;  %v1340_v28 = vmul.f32 %v2124_v57, %v2848_v13  ;;  %v2126_v5 = vpop.eup %2125 }
 0x20c   : > { %v1205_v21 = vadd.f32 %v1204_v52, %v1203_v25  ;;  %v1302_v48 = vadd.f32 %v1301_v30, %v1300_v10  ;;  %v1308_v39 = vrot.slane %v1307_v14, 4  ;;  %1743 = vst.msk [vmem:[%s3111_s12 + $0x98] sm:$0xff] %vm938_vm1, %v1358_v1  ;;  %1468 = vperm.xlu0 %2024, %v1358_v1   ;;  %1742 = vst.msk [vmem:[%s3111_s12 + $0x90] sm:$0xff] %vm938_vm1, %v1357_v2  ;;  %v1247_v27 = vrot.slane %v1246_v63, 2 }
 0x20d   : > { %2137 = vrcp.f32 %v1232_v45  ;;  %v1221_v8 = vadd.f32 %v1220_v40, %v1219_v19  ;;  %v1291_v15 = vadd.f32 %v1290_v7, %v3082_v29  ;;  %1463 = vperm.xlu1 %2023, %v1357_v2   ;;  %1724 = vst.msk [vmem:[%s3111_s12] sm:$0xff] %vm938_vm1, %v1339_v41  ;;  %1725 = vst.msk [vmem:[%s3111_s12 + $0x8] sm:$0xff] %vm938_vm1, %v1340_v28 }
 0x20e   : > { %v1356_v62 = vmul.f32 %v2126_v5, %v2864_v23  ;;  %v1355_v13 = vmul.f32 %v2126_v5, %v2859_v51  ;;  %2139 = vrcp.f32 %v1205_v21  ;;  %v1303_v20 = vrot.slane %v1302_v48, 1  ;;  %v3161_v22 = vpop.eup %2127 }
 0x20f   : > { %v1222_v35 = vrot.slane %v1221_v8, 1  ;;  %v1292_v31 = vrot.slane %v1291_v15, 2  ;;  %v3166_v29 = vpop.eup %2129  ;;  %v1314_v7 = vsel %vm938_vm1, %v3161_v22, 0.0  ;;  %v1237_v23 = vadd.f32 %v1236_v17, %v1235_v49 }
 0x210   : > { %1741 = vst.msk [vmem:[%s3111_s12 + $0x88] sm:$0xff] %vm938_vm1, %v1356_v62  ;;  %1740 = vst.msk [vmem:[%s3111_s12 + $0x80] sm:$0xff] %vm938_vm1, %v1355_v13  ;;  %v1304_v51 = vadd.f32 %v1303_v20, %v1302_v48  ;;  %v1309_v3 = vadd.f32 %v1308_v39, %v1307_v14  ;;  %v2132_v26 = vpop.eup %2131  ;;  %v1315_v44 = vsel %vm938_vm1, %v3166_v29, 0.0  ;;  %1373 = vperm.xlu0 %2024, %v1339_v41  }
 0x211   : > { %v1223_v25 = vadd.f32 %v1222_v35, %v1221_v8  ;;  %v1293_v61 = vadd.f32 %v1292_v31, %v1291_v15  ;;  %v1316_v38 = vadd.f32 %v1315_v44, %v1314_v7  ;;  %1378 = vperm.xlu1 %2023, %v1340_v28   ;;  %v1362_v19 = vmul.f32 %v2132_v26, %v2913_v24 }
 0x212   : > { %v2134_v10 = vpop.eup %2133  ;;  %v3178_v49 = vmul.f32 %v2132_v26, %v2907_v34  ;;  %2141 = vrcp.f32 %v1304_v51  ;;  %v1248_v24 = vadd.f32 %v1247_v27, %v1246_v63  ;;  %v1310_v30 = vrot.slane %v1309_v3, 2 }
 0x213   : > { %v2136_v17 = vpop.eup %2135  ;;  %v1345_v36 = vmul.f32 %v2134_v10, %v2888_v37  ;;  %v1346_v50 = vmul.f32 %v2134_v10, %v2894_v9  ;;  %2143 = vrcp.f32 %v1223_v25  ;;  %v1294_v12 = vrot.slane %v1293_v61, 1  ;;  %1747 = vst.msk [vmem:[%s3111_s12 + $0xb8] sm:$0xff] %vm938_vm1, %v1362_v19 }
 0x214   : > { %v1317_v43 = vrot.slane %v1316_v38, 4  ;;  %v1360_v52 = vmul.f32 %v2136_v17, %v2975_v4  ;;  %1746 = vst.msk [vmem:[%s3111_s12 + $0xb0] sm:$0xff] %vm938_vm1, %v3178_v49  ;;  %v3189_v34 = vmul.f32 %v2136_v17, %v2972_v60  ;;  %1458 = vperm.xlu0 %2024, %v1356_v62   ;;  %v1238_v9 = vrot.slane %v1237_v23, 2  ;;  %v2158_v17 = vld [vmem:[%s2351_s17 + $0x90] sm:$0xff] }
 0x215   : > { %1730 = vst.msk [vmem:[%s3111_s12 + $0x30] sm:$0xff] %vm938_vm1, %v1345_v36  ;;  %1731 = vst.msk [vmem:[%s3111_s12 + $0x38] sm:$0xff] %vm938_vm1, %v1346_v50  ;;  %v1295_v37 = vadd.f32 %v1294_v12, %v1293_v61  ;;  %1453 = vperm.xlu1 %2023, %v1355_v13   ;;  %v1249_v4 = vrot.slane %v1248_v24, 1  ;;  %v1311_v14 = vadd.f32 %v1310_v30, %v1309_v3 }
 0x216   : > { %1745 = vst.msk [vmem:[%s3111_s12 + $0xa8] sm:$0xff] %vm938_vm1, %v1360_v52  ;;  %1744 = vst.msk [vmem:[%s3111_s12 + $0xa0] sm:$0xff] %vm938_vm1, %v3189_v34  ;;  %v1318_v40 = vadd.f32 %v1317_v43, %v1316_v38  ;;  %v1239_v57 = vadd.f32 %v1238_v9, %v1237_v23  ;;  %v2157_v38 = vld [vmem:[%s2351_s17 + $0x98] sm:$0xff] }
 0x217   : > { %v2138_v60 = vpop.eup %2137  ;;  %2145 = vrcp.f32 %v1295_v37  ;;  %v1250_v41 = vadd.f32 %v1249_v4, %v1248_v24  ;;  %v1312_v39 = vrot.slane %v1311_v14, 1  ;;  %v2159_v37 = vld [vmem:[%s2351_s17] sm:$0xff]  ;;  %v2160_v4 = vld [vmem:[%s2351_s17 + $0x8] sm:$0xff] }
 0x218   : > { %v2140_v1 = vpop.eup %2139  ;;  %v1350_v2 = vmul.f32 %v2138_v60, %v3013_v58  ;;  %v3202_v45 = vmul.f32 %v2138_v60, %v3004_v56  ;;  %v1319_v28 = vrot.slane %v1318_v40, 2  ;;  %1488 = vperm.xlu0 %2024, %v1362_v19   ;;  %v1240_v5 = vrot.slane %v1239_v57, 1 }
 0x219   : > { %v1343_v21 = vmul.f32 %v2140_v1, %v2950_v33  ;;  %v1344_v48 = vmul.f32 %v2140_v1, %v2954_v16  ;;  %1403 = vperm.xlu1 %2023, %v1345_v36   ;;  %2147 = vrcp.f32 %v1250_v41  ;;  %v1313_v33 = vadd.f32 %v1312_v39, %v1311_v14  ;;  %v2162_v39 = vld [vmem:[%s2351_s17 + $0x80] sm:$0xff] }
 0x21a   : > { %1735 = vst.msk [vmem:[%s3111_s12 + $0x58] sm:$0xff] %vm938_vm1, %v1350_v2  ;;  %1734 = vst.msk [vmem:[%s3111_s12 + $0x50] sm:$0xff] %vm938_vm1, %v3202_v45  ;;  %v1320_v58 = vadd.f32 %v1319_v28, %v1318_v40  ;;  %v1241_v56 = vadd.f32 %v1240_v5, %v1239_v57 }
 0x21b   : > { %1728 = vst.msk [vmem:[%s3111_s12 + $0x20] sm:$0xff] %vm938_vm1, %v1343_v21  ;;  %1729 = vst.msk [vmem:[%s3111_s12 + $0x28] sm:$0xff] %vm938_vm1, %v1344_v48 }
 0x21c   : > { %v2142_v16 = vpop.eup %2141  ;;  %v1321_v8 = vrot.slane %v1320_v58, 1  ;;  %1478 = vperm.xlu0 %2024, %v1360_v52   ;;  %2149 = vrcp.f32 %v1241_v56 }
 0x21d   : > { %v2144_v15 = vpop.eup %2143  ;;  %v1366_v62 = vmul.f32 %v2142_v16, %v3027_v46  ;;  %v1365_v13 = vmul.f32 %v2142_v16, %v3023_v55  ;;  %1408 = vperm.xlu1 %2023, %v1346_v50   ;;  %2151 = vrcp.f32 %v1313_v33 }
 0x21e   : > { %v1348_v20 = vmul.f32 %v2144_v15, %v3061_v32  ;;  %v1347_v35 = vmul.f32 %v2144_v15, %v3059_v11  ;;  %v1322_v31 = vadd.f32 %v1321_v8, %v1320_v58 }
 0x21f   : > { %1751 = vst.msk [vmem:[%s3111_s12 + $0xd8] sm:$0xff] %vm938_vm1, %v1366_v62  ;;  %1750 = vst.msk [vmem:[%s3111_s12 + $0xd0] sm:$0xff] %vm938_vm1, %v1365_v13 }
 0x220   : > { %1733 = vst.msk [vmem:[%s3111_s12 + $0x48] sm:$0xff] %vm938_vm1, %v1348_v20  ;;  %1732 = vst.msk [vmem:[%s3111_s12 + $0x40] sm:$0xff] %vm938_vm1, %v1347_v35  ;;  %2153 = vrcp.f32 %v1322_v31  ;;  %1428 = vperm.xlu0 %2024, %v1350_v2  }
 0x221   : > { %v2146_v55 = vpop.eup %2145  ;;  %1483 = vperm.xlu1 %2023, %v3178_v49  }
 0x222   : > { %v1364_v46 = vmul.f32 %v2146_v55, %v3071_v59  ;;  %v1363_v11 = vmul.f32 %v2146_v55, %v3065_v42 }
 0x223   : > { %v2148_v32 = vpop.eup %2147 }
 0x224   : > { %1749 = vst.msk [vmem:[%s3111_s12 + $0xc8] sm:$0xff] %vm938_vm1, %v1364_v46  ;;  %1748 = vst.msk [vmem:[%s3111_s12 + $0xc0] sm:$0xff] %vm938_vm1, %v1363_v11  ;;  %1508 = vperm.xlu0 %2024, %v1366_v62   ;;  %v1354_v63 = vmul.f32 %v2148_v32, %v3084_v6  ;;  %v1353_v7 = vmul.f32 %v2148_v32, %v3079_v53 }
 0x225   : > { %1393 = vperm.xlu1 %2023, %v1343_v21   ;;  %v2161_v21 = vld [vmem:[%s2351_s17 + $0x88] sm:$0xff] }
 0x226   : > { %v2150_v51 = vpop.eup %2149  ;;  %1739 = vst.msk [vmem:[%s3111_s12 + $0x78] sm:$0xff] %vm938_vm1, %v1354_v63  ;;  %1738 = vst.msk [vmem:[%s3111_s12 + $0x70] sm:$0xff] %vm938_vm1, %v1353_v7 }
 0x227   : > { %v2152_v42 = vpop.eup %2151  ;;  %v1352_v59 = vmul.f32 %v2150_v51, %v3120_v54  ;;  %v1351_v23 = vmul.f32 %v2150_v51, %v3116_v18 }
 0x228   : > { %1418 = vperm.xlu0 %2024, %v1348_v20   ;;  %v1368_v6 = vmul.f32 %v2152_v42, %v3138_v0  ;;  %v1367_v3 = vmul.f32 %v2152_v42, %v3130_v47  ;;  %v2155_v47 = vld [vmem:[%s2351_s17 + $0x10] sm:$0xff] }
 0x229   : > { %1398 = vperm.xlu1 %2023, %v1344_v48   ;;  %1737 = vst.msk [vmem:[%s3111_s12 + $0x68] sm:$0xff] %vm938_vm1, %v1352_v59  ;;  %1736 = vst.msk [vmem:[%s3111_s12 + $0x60] sm:$0xff] %vm938_vm1, %v1351_v23 }
 0x22a   : > { %v2154_v53 = vpop.eup %2153  ;;  %1753 = vst.msk [vmem:[%s3111_s12 + $0xe8] sm:$0xff] %vm938_vm1, %v1368_v6  ;;  %1752 = vst.msk [vmem:[%s3111_s12 + $0xe0] sm:$0xff] %vm938_vm1, %v1367_v3 }
 0x22b   : > { %v1370_v26 = vmul.f32 %v2154_v53, %v3166_v29  ;;  %v1369_v54 = vmul.f32 %v2154_v53, %v3161_v22  ;;  %v2156_v29 = vld [vmem:[%s2351_s17 + $0x18] sm:$0xff] }
 0x22c   : > { %1498 = vperm.xlu0 %2024, %v1364_v46  }
 0x22d   : > { %1755 = vst.msk [vmem:[%s3111_s12 + $0xf8] sm:$0xff] %vm938_vm1, %v1370_v26  ;;  %1754 = vst.msk [vmem:[%s3111_s12 + $0xf0] sm:$0xff] %vm938_vm1, %v1369_v54  ;;  %1473 = vperm.xlu1 %2023, %v3189_v34  }
 0x230   : > { %1448 = vperm.xlu0 %2024, %v1354_v63   ;;  %v2163_v63 = vld [vmem:[%s2351_s17 + $0x30] sm:$0xff] }
 0x231   : > { %1423 = vperm.xlu1 %2023, %v3202_v45  }
 0x234   : > { %1438 = vperm.xlu0 %2024, %v1352_v59  }
 0x235   : > { %1503 = vperm.xlu1 %2023, %v1365_v13  }
 0x238   : > { %1518 = vperm.xlu0 %2024, %v1368_v6  }
 0x239   : > { %1413 = vperm.xlu1 %2023, %v1347_v35  }
 0x23c   : > { %1528 = vperm.xlu0 %2024, %v1370_v26  }
 0x23d   : > { %1493 = vperm.xlu1 %2023, %v1363_v11  }
 0x241   : > { %1443 = vperm.xlu1 %2023, %v1353_v7  }
 0x245   : > { %1433 = vperm.xlu1 %2023, %v1351_v23  }
 0x249   : > { %1513 = vperm.xlu1 %2023, %v1367_v3   ;;  %v2164_v3 = vld [vmem:[%s2351_s17 + $0x38] sm:$0xff] }
 0x24d   : > { %1523 = vperm.xlu1 %2023, %v1369_v54  }
 0x284   : > { %v1384_v18 = vpop.permute.xlu1 %1383 }
 0x285   : > { %v1533_v0 = vmul.f32 %v2155_v47, %v1384_v18  ;;  %v2165_v18 = vld [vmem:[%s2351_s17 + $0xb8] sm:$0xff] }
 0x287   : > { %v1572_v25 = vsel %vm402_vm0, %v1533_v0, 0.0 }
 0x288   : > { %v1389_v22 = vpop.permute.xlu1 %1388 }
 0x289   : > { %v1534_v44 = vmul.f32 %v2156_v29, %v1389_v22 }
 0x28b   : > { %v1573_v61 = vsel %vm402_vm0, %v1534_v44, 0.0  ;;  %v1469_v27 = vpop.permute.xlu0 %1468 }
 0x28c   : > { %v1574_v10 = vadd.f32 %v1573_v61, %v1572_v25  ;;  %v1550_v19 = vmul.f32 %v2157_v38, %v1469_v27  ;;  %v1464_v49 = vpop.permute.xlu1 %1463 }
 0x28d   : > { %v1549_v36 = vmul.f32 %v2158_v17, %v1464_v49 }
 0x28e   : > { %v1575_v50 = vrot.slane %v1574_v10, 4  ;;  %v1645_v12 = vsel %vm402_vm0, %v1550_v19, 0.0 }
 0x28f   : > { %v1644_v43 = vsel %vm402_vm0, %v1549_v36, 0.0  ;;  %v1374_v52 = vpop.permute.xlu0 %1373 }
 0x290   : > { %v1576_v34 = vadd.f32 %v1575_v50, %v1574_v10  ;;  %v1646_v24 = vadd.f32 %v1645_v12, %v1644_v43  ;;  %v1531_v9 = vmul.f32 %v2159_v37, %v1374_v52  ;;  %v1379_v30 = vpop.permute.xlu1 %1378  ;;  %v2166_v10 = vld [vmem:[%s2351_s17 + $0xb0] sm:$0xff] }
 0x291   : > { %v1532_v40 = vmul.f32 %v2160_v4, %v1379_v30 }
 0x292   : > { %v1577_v60 = vrot.slane %v1576_v34, 2  ;;  %v1647_v57 = vrot.slane %v1646_v24, 4  ;;  %v1563_v14 = vsel %vm402_vm0, %v1531_v9, 0.0  ;;  %v2167_v9 = vld [vmem:[%s2351_s17 + $0x20] sm:$0xff] }
 0x293   : > { %v1564_v1 = vsel %vm402_vm0, %v1532_v40, 0.0  ;;  %v1459_v2 = vpop.permute.xlu0 %1458 }
 0x294   : > { %v1578_v45 = vadd.f32 %v1577_v60, %v1576_v34  ;;  %v1648_v41 = vadd.f32 %v1647_v57, %v1646_v24  ;;  %v1565_v28 = vadd.f32 %v1564_v1, %v1563_v14  ;;  %v1548_v48 = vmul.f32 %v2161_v21, %v1459_v2  ;;  %v1454_v5 = vpop.permute.xlu1 %1453  ;;  %v2168_v57 = vld [vmem:[%s2351_s17 + $0x28] sm:$0xff] }
 0x295   : > { %v1547_v58 = vmul.f32 %v2162_v39, %v1454_v5 }
 0x296   : > { %v1579_v56 = vrot.slane %v1578_v45, 1  ;;  %v1649_v33 = vrot.slane %v1648_v41, 2  ;;  %v1566_v16 = vrot.slane %v1565_v28, 4  ;;  %v1636_v8 = vsel %vm402_vm0, %v1548_v48, 0.0 }
 0x297   : > { %v1635_v15 = vsel %vm402_vm0, %v1547_v58, 0.0  ;;  %v1489_v62 = vpop.permute.xlu0 %1488 }
 0x298   : > { %v1580_v13 = vadd.f32 %v1579_v56, %v1578_v45  ;;  %v1650_v20 = vadd.f32 %v1649_v33, %v1648_v41  ;;  %v1567_v35 = vadd.f32 %v1566_v16, %v1565_v28  ;;  %v1637_v31 = vadd.f32 %v1636_v8, %v1635_v15  ;;  %v1404_v55 = vpop.permute.xlu1 %1403  ;;  %v2169_v41 = vld [vmem:[%s2351_s17 + $0xa8] sm:$0xff]  ;;  %v2170_v33 = vld [vmem:[%s2351_s17 + $0xa0] sm:$0xff] }
 0x299   : > { %v1537_v7 = vmul.f32 %v2163_v63, %v1404_v55  ;;  %v1554_v47 = vmul.f32 %v2165_v18, %v1489_v62  ;;  %v2172_v63 = vld [vmem:[%s2351_s17 + $0x50] sm:$0xff] }
 0x29a   : > { %1709 = vst.msk [vmem:[%s3279_s15 + $0x1] sm:$0x1] %vm1707_vm2, %v1580_v13  ;;  %v1651_v46 = vrot.slane %v1650_v20, 1  ;;  %v1568_v11 = vrot.slane %v1567_v35, 2  ;;  %v1638_v32 = vrot.slane %v1637_v31, 4  ;;  %v2171_v13 = vld [vmem:[%s2351_s17 + $0x58] sm:$0xff] }
 0x29b   : > { %v1479_v51 = vpop.permute.xlu0 %1478  ;;  %v1590_v0 = vsel %vm402_vm0, %v1537_v7, 0.0  ;;  %v1663_v17 = vsel %vm402_vm0, %v1554_v47, 0.0  ;;  %v2174_v47 = vld [vmem:[%s2351_s17 + $0xd0] sm:$0xff] }
 0x29c   : > { %v1652_v42 = vadd.f32 %v1651_v46, %v1650_v20  ;;  %v1569_v59 = vadd.f32 %v1568_v11, %v1567_v35  ;;  %v1639_v23 = vadd.f32 %v1638_v32, %v1637_v31  ;;  %v1409_v6 = vpop.permute.xlu1 %1408  ;;  %v1552_v28 = vmul.f32 %v2169_v41, %v1479_v51 }
 0x29d   : > { %v1538_v53 = vmul.f32 %v2164_v3, %v1409_v6 }
 0x29e   : > { %1717 = vst.msk [vmem:[%s3279_s15 + $0x9] sm:$0x1] %vm1707_vm2, %v1652_v42  ;;  %v1570_v26 = vrot.slane %v1569_v59, 1  ;;  %v1640_v54 = vrot.slane %v1639_v23, 2  ;;  %v1654_v62 = vsel %vm402_vm0, %v1552_v28, 0.0 }
 0x29f   : > { %v1591_v22 = vsel %vm402_vm0, %v1538_v53, 0.0  ;;  %v1429_v29 = vpop.permute.xlu0 %1428 }
 0x2a0   : > { %v1571_v44 = vadd.f32 %v1570_v26, %v1569_v59  ;;  %v1641_v25 = vadd.f32 %v1640_v54, %v1639_v23  ;;  %v1592_v61 = vadd.f32 %v1591_v22, %v1590_v0  ;;  %v1484_v27 = vpop.permute.xlu1 %1483  ;;  %v1542_v20 = vmul.f32 %v2171_v13, %v1429_v29  ;;  %v2173_v23 = vld [vmem:[%s2351_s17 + $0xd8] sm:$0xff]  ;;  %v2180_v13 = vld [vmem:[%s2351_s17 + $0x70] sm:$0xff] }
 0x2a1   : > { %v1553_v38 = vmul.f32 %v2166_v10, %v1484_v27  ;;  %v2175_v27 = vld [vmem:[%s2351_s17 + $0x48] sm:$0xff] }
 0x2a2   : > { %1708 = vst.msk [vmem:[%s3279_s15] sm:$0x1] %vm1707_vm2, %v1571_v44  ;;  %v1642_v19 = vrot.slane %v1641_v25, 1  ;;  %v1593_v49 = vrot.slane %v1592_v61, 4  ;;  %v1609_v59 = vsel %vm402_vm0, %v1542_v20, 0.0 }
 0x2a3   : > { %v1662_v36 = vsel %vm402_vm0, %v1553_v38, 0.0  ;;  %v1509_v34 = vpop.permute.xlu0 %1508 }
 0x2a4   : > { %v1643_v50 = vadd.f32 %v1642_v19, %v1641_v25  ;;  %v1594_v12 = vadd.f32 %v1593_v49, %v1592_v61  ;;  %v1664_v43 = vadd.f32 %v1663_v17, %v1662_v36  ;;  %v1394_v52 = vpop.permute.xlu1 %1393  ;;  %v1558_v6 = vmul.f32 %v2173_v23, %v1509_v34 }
 0x2a5   : > { %v1535_v30 = vmul.f32 %v2167_v9, %v1394_v52  ;;  %v2177_v9 = vld [vmem:[%s2351_s17 + $0xc8] sm:$0xff] }
 0x2a6   : > { %1716 = vst.msk [vmem:[%s3279_s15 + $0x8] sm:$0x1] %vm1707_vm2, %v1643_v50  ;;  %v1595_v24 = vrot.slane %v1594_v12, 2  ;;  %v1665_v37 = vrot.slane %v1664_v43, 4  ;;  %v1681_v61 = vsel %vm402_vm0, %v1558_v6, 0.0 }
 0x2a7   : > { %v1419_v45 = vpop.permute.xlu0 %1418  ;;  %v1581_v21 = vsel %vm402_vm0, %v1535_v30, 0.0 }
 0x2a8   : > { %v1596_v4 = vadd.f32 %v1595_v24, %v1594_v12  ;;  %v1666_v40 = vadd.f32 %v1665_v37, %v1664_v43  ;;  %v1399_v60 = vpop.permute.xlu1 %1398  ;;  %v1540_v10 = vmul.f32 %v2175_v27, %v1419_v45  ;;  %v2176_v12 = vld [vmem:[%s2351_s17 + $0x40] sm:$0xff] }
 0x2a9   : > { %v1536_v14 = vmul.f32 %v2168_v57, %v1399_v60  ;;  %v2178_v45 = vld [vmem:[%s2351_s17 + $0xc0] sm:$0xff] }
 0x2aa   : > { %v1597_v1 = vrot.slane %v1596_v4, 1  ;;  %v1667_v2 = vrot.slane %v1666_v40, 2  ;;  %v1600_v37 = vsel %vm402_vm0, %v1540_v10, 0.0 }
 0x2ab   : > { %v1582_v48 = vsel %vm402_vm0, %v1536_v14, 0.0  ;;  %v1499_v11 = vpop.permute.xlu0 %1498 }
 0x2ac   : > { %v1598_v5 = vadd.f32 %v1597_v1, %v1596_v4  ;;  %v1668_v39 = vadd.f32 %v1667_v2, %v1666_v40  ;;  %v1583_v58 = vadd.f32 %v1582_v48, %v1581_v21  ;;  %v1474_v56 = vpop.permute.xlu1 %1473  ;;  %v1556_v30 = vmul.f32 %v2177_v9, %v1499_v11 }
 0x2ad   : > { %v1551_v16 = vmul.f32 %v2170_v33, %v1474_v56 }
 0x2ae   : > { %1711 = vst.msk [vmem:[%s3279_s15 + $0x3] sm:$0x1] %vm1707_vm2, %v1598_v5  ;;  %v1669_v8 = vrot.slane %v1668_v39, 1  ;;  %v1584_v15 = vrot.slane %v1583_v58, 4  ;;  %v1672_v5 = vsel %vm402_vm0, %v1556_v30, 0.0 }
 0x2af   : > { %v1653_v35 = vsel %vm402_vm0, %v1551_v16, 0.0  ;;  %v1449_v25 = vpop.permute.xlu0 %1448 }
 0x2b0   : > { %v1670_v31 = vadd.f32 %v1669_v8, %v1668_v39  ;;  %v1585_v55 = vadd.f32 %v1584_v15, %v1583_v58  ;;  %v1655_v46 = vadd.f32 %v1654_v62, %v1653_v35  ;;  %v1424_v32 = vpop.permute.xlu1 %1423  ;;  %v2179_v39 = vld [vmem:[%s2351_s17 + $0x78] sm:$0xff] }
 0x2b1   : > { %v1541_v7 = vmul.f32 %v2172_v63, %v1424_v32  ;;  %v1546_v58 = vmul.f32 %v2179_v39, %v1449_v25  ;;  %v2181_v32 = vld [vmem:[%s2351_s17 + $0x68] sm:$0xff] }
 0x2b2   : > { %1719 = vst.msk [vmem:[%s3279_s15 + $0xb] sm:$0x1] %vm1707_vm2, %v1670_v31  ;;  %v1586_v51 = vrot.slane %v1585_v55, 2  ;;  %v1656_v42 = vrot.slane %v1655_v46, 4 }
 0x2b3   : > { %v1608_v3 = vsel %vm402_vm0, %v1541_v7, 0.0  ;;  %v1439_v14 = vpop.permute.xlu0 %1438  ;;  %v1627_v11 = vsel %vm402_vm0, %v1546_v58, 0.0 }
 0x2b4   : > { %v1587_v53 = vadd.f32 %v1586_v51, %v1585_v55  ;;  %v1657_v26 = vadd.f32 %v1656_v42, %v1655_v46  ;;  %v1610_v54 = vadd.f32 %v1609_v59, %v1608_v3  ;;  %v1504_v18 = vpop.permute.xlu1 %1503  ;;  %v1544_v63 = vmul.f32 %v2181_v32, %v1439_v14  ;;  %v2182_v3 = vld [vmem:[%s2351_s17 + $0x60] sm:$0xff] }
 0x2b5   : > { %v1557_v0 = vmul.f32 %v2174_v47, %v1504_v18 }
 0x2b6   : > { %v1588_v22 = vrot.slane %v1587_v53, 1  ;;  %v1658_v29 = vrot.slane %v1657_v26, 2  ;;  %v1611_v44 = vrot.slane %v1610_v54, 4  ;;  %v1618_v47 = vsel %vm402_vm0, %v1544_v63, 0.0 }
 0x2b7   : > { %v1680_v38 = vsel %vm402_vm0, %v1557_v0, 0.0  ;;  %v1519_v55 = vpop.permute.xlu0 %1518  ;;  %v2183_v0 = vld [vmem:[%s2351_s17 + $0xe8] sm:$0xff] }
 0x2b8   : > { %v1589_v19 = vadd.f32 %v1588_v22, %v1587_v53  ;;  %v1659_v49 = vadd.f32 %v1658_v29, %v1657_v26  ;;  %v1612_v17 = vadd.f32 %v1611_v44, %v1610_v54  ;;  %v1682_v36 = vadd.f32 %v1681_v61, %v1680_v38  ;;  %v1414_v50 = vpop.permute.xlu1 %1413 }
 0x2b9   : > { %v1539_v43 = vmul.f32 %v2176_v12, %v1414_v50  ;;  %v1560_v22 = vmul.f32 %v2183_v0, %v1519_v55 }
 0x2ba   : > { %1710 = vst.msk [vmem:[%s3279_s15 + $0x2] sm:$0x1] %vm1707_vm2, %v1589_v19  ;;  %v1660_v52 = vrot.slane %v1659_v49, 1  ;;  %v1613_v34 = vrot.slane %v1612_v17, 2  ;;  %v1683_v24 = vrot.slane %v1682_v36, 4  ;;  %v2184_v19 = vld [vmem:[%s2351_s17 + $0xe0] sm:$0xff] }
 0x2bb   : > { %v1599_v4 = vsel %vm402_vm0, %v1539_v43, 0.0  ;;  %v1529_v61 = vpop.permute.xlu0 %1528  ;;  %v1690_v12 = vsel %vm402_vm0, %v1560_v22, 0.0  ;;  %v2185_v43 = vld [vmem:[%s2351_s17 + $0xf8] sm:$0xff] }
 0x2bc   : > { %v1661_v40 = vadd.f32 %v1660_v52, %v1659_v49  ;;  %v1614_v60 = vadd.f32 %v1613_v34, %v1612_v17  ;;  %v1684_v57 = vadd.f32 %v1683_v24, %v1682_v36  ;;  %v1601_v1 = vadd.f32 %v1600_v37, %v1599_v4  ;;  %v1494_v2 = vpop.permute.xlu1 %1493 }
 0x2bd   : > { %v1555_v41 = vmul.f32 %v2178_v45, %v1494_v2  ;;  %v1562_v52 = vmul.f32 %v2185_v43, %v1529_v61 }
 0x2be   : > { %1718 = vst.msk [vmem:[%s3279_s15 + $0xa] sm:$0x1] %vm1707_vm2, %v1661_v40  ;;  %v1615_v28 = vrot.slane %v1614_v60, 1  ;;  %v1685_v21 = vrot.slane %v1684_v57, 2  ;;  %v1602_v48 = vrot.slane %v1601_v1, 4  ;;  %v2186_v40 = vld [vmem:[%s2351_s17 + $0xf0] sm:$0xff] }
 0x2bf   : > { %v1671_v56 = vsel %vm402_vm0, %v1555_v41, 0.0  ;;  %v1699_v2 = vsel %vm402_vm0, %v1562_v52, 0.0  ;;  %s1776_s17 = sshll.u32 %s3279_s15, 4  ;;  %s3366_s17 = int_to_ptr.vmem [resolvable:$true] %s1776_s17 }
 0x2c0   : > { %v1616_v33 = vadd.f32 %v1615_v28, %v1614_v60  ;;  %v1686_v16 = vadd.f32 %v1685_v21, %v1684_v57  ;;  %v1603_v8 = vadd.f32 %v1602_v48, %v1601_v1  ;;  %v1673_v15 = vadd.f32 %v1672_v5, %v1671_v56  ;;  %v1444_v62 = vpop.permute.xlu1 %1443  ;;  %s2187_s25 = scalar_lea.vmem %s3366_s17, 256  ;;  %p2194_p0 = scmp.lt.s32.totalorder %s3366_s17, %s2192_s29 }
 0x2c1   : > { %v1545_v20 = vmul.f32 %v2180_v13, %v1444_v62  ;;  %p2188_p11 = scmp.ne.s32.totalorder %s3366_s17, %s2187_s25  ;;  %p2195_p1 = scmp.lt.s32.totalorder %s2193_s9, %s2187_s25 }
 0x2c2   : > { %1713 = vst.msk [vmem:[%s3279_s15 + $0x5] sm:$0x1] %vm1707_vm2, %v1616_v33  ;;  %v1687_v35 = vrot.slane %v1686_v16, 1  ;;  %v1604_v31 = vrot.slane %v1603_v8, 2  ;;  %v1674_v46 = vrot.slane %v1673_v15, 4 }
 0x2c3   : > { %v1626_v7 = vsel %vm402_vm0, %v1545_v20, 0.0  ;;  %p2189_p12 = pnand %p2188_p11, %p2328_p5  ;;  %p2196_p2 = por %p2195_p1, %p2194_p0 }
 0x2c4   : > { %v1688_v51 = vadd.f32 %v1687_v35, %v1686_v16  ;;  %v1605_v42 = vadd.f32 %v1604_v31, %v1603_v8  ;;  %v1675_v59 = vadd.f32 %v1674_v46, %v1673_v15  ;;  %v1628_v23 = vadd.f32 %v1627_v11, %v1626_v7  ;;  %v1434_v6 = vpop.permute.xlu1 %1433 }
 0x2c5   : > { %v1543_v53 = vmul.f32 %v2182_v3, %v1434_v6  ;;  %p2190_p13 = pneg %p2189_p12 }
 0x2c6   : > { %1721 = vst.msk [vmem:[%s3279_s15 + $0xd] sm:$0x1] %vm1707_vm2, %v1688_v51  ;;  %v1606_v26 = vrot.slane %v1605_v42, 1  ;;  %v1676_v54 = vrot.slane %v1675_v59, 2  ;;  %v1629_v18 = vrot.slane %v1628_v23, 4 }
 0x2c7   : > { %v1617_v29 = vsel %vm402_vm0, %v1543_v53, 0.0  ;;  %p2197_p3 = pnand %p2196_p2, %p2190_p13 }
 0x2c8   : > { %v1607_v44 = vadd.f32 %v1606_v26, %v1605_v42  ;;  %v1677_v25 = vadd.f32 %v1676_v54, %v1675_v59  ;;  %v1630_v27 = vadd.f32 %v1629_v18, %v1628_v23  ;;  %v1619_v10 = vadd.f32 %v1618_v47, %v1617_v29  ;;  %v1514_v38 = vpop.permute.xlu1 %1513 }
 0x2c9   : > { %v1559_v49 = vmul.f32 %v2184_v19, %v1514_v38 }
 0x2ca   : > { %1712 = vst.msk [vmem:[%s3279_s15 + $0x4] sm:$0x1] %vm1707_vm2, %v1607_v44  ;;  %v1678_v17 = vrot.slane %v1677_v25, 1  ;;  %v1631_v36 = vrot.slane %v1630_v27, 2  ;;  %v1620_v50 = vrot.slane %v1619_v10, 4 }
 0x2cb   : > { %v1689_v34 = vsel %vm402_vm0, %v1559_v49, 0.0 }
 0x2cc   : > { %v1679_v24 = vadd.f32 %v1678_v17, %v1677_v25  ;;  %v1632_v37 = vadd.f32 %v1631_v36, %v1630_v27  ;;  %v1621_v9 = vadd.f32 %v1620_v50, %v1619_v10  ;;  %v1691_v30 = vadd.f32 %v1690_v12, %v1689_v34  ;;  %v1524_v4 = vpop.permute.xlu1 %1523 }
 0x2cd   : > { %v1561_v60 = vmul.f32 %v2186_v40, %v1524_v4 }
 0x2ce   : > { %1720 = vst.msk [vmem:[%s3279_s15 + $0xc] sm:$0x1] %vm1707_vm2, %v1679_v24  ;;  %v1633_v57 = vrot.slane %v1632_v37, 1  ;;  %v1622_v14 = vrot.slane %v1621_v9, 2  ;;  %v1692_v1 = vrot.slane %v1691_v30, 4 }
 0x2cf   : > { %v1698_v45 = vsel %vm402_vm0, %v1561_v60, 0.0 }
 0x2d0   : > { %v1634_v41 = vadd.f32 %v1633_v57, %v1632_v37  ;;  %v1623_v28 = vadd.f32 %v1622_v14, %v1621_v9  ;;  %v1693_v21 = vadd.f32 %v1692_v1, %v1691_v30  ;;  %v1700_v48 = vadd.f32 %v1699_v2, %v1698_v45 }
 0x2d2   : > { %1715 = vst.msk [vmem:[%s3279_s15 + $0x7] sm:$0x1] %vm1707_vm2, %v1634_v41  ;;  %v1624_v5 = vrot.slane %v1623_v28, 1  ;;  %v1694_v39 = vrot.slane %v1693_v21, 2  ;;  %v1701_v58 = vrot.slane %v1700_v48, 4 }
 0x2d4   : > { %v1625_v56 = vadd.f32 %v1624_v5, %v1623_v28  ;;  %v1695_v33 = vadd.f32 %v1694_v39, %v1693_v21  ;;  %v1702_v16 = vadd.f32 %v1701_v58, %v1700_v48 }
 0x2d6   : > { %1714 = vst.msk [vmem:[%s3279_s15 + $0x6] sm:$0x1] %vm1707_vm2, %v1625_v56  ;;  %v1696_v8 = vrot.slane %v1695_v33, 1  ;;  %v1703_v15 = vrot.slane %v1702_v16, 2 }
 0x2d8   : > { %v1697_v62 = vadd.f32 %v1696_v8, %v1695_v33  ;;  %v1704_v13 = vadd.f32 %v1703_v15, %v1702_v16 }
 0x2da   : > { %1722 = vst.msk [vmem:[%s3279_s15 + $0xe] sm:$0x1] %vm1707_vm2, %v1697_v62  ;;  %v1705_v20 = vrot.slane %v1704_v13, 1 }
 0x2dc   : > { %v1706_v35 = vadd.f32 %v1705_v20, %v1704_v13 }
 0x2de   : > { %1723 = vst.msk [vmem:[%s3279_s15 + $0xf] sm:$0x1] %vm1707_vm2, %v1706_v35 }
 0x2df   : > { %2200 = shalt.err (!%p2197_p3)
}
 0x2e0   : > { %s2201_s10 = scalar_lea.hbm %s3364_s20, 256  ;;  %s2205_s13 = scalar_lea.hbm %s3418_s5, 512 }
 0x2e1   : > { %p2202_p4 = scmp.ne.s32.totalorder %s3364_s20, %s2201_s10  ;;  %p2206_p9 = scmp.lt.u32.totalorder %s3364_s20, %s3418_s5 }
 0x2e2   : > { %p2207_p10 = scmp.lt.u32.totalorder %s2205_s13, %s2201_s10  ;;  %p2209_p12 = scmp.lt.u32.totalorder %s2201_s10, %s3364_s20 }
 0x2e3   : > { %p2203_p7 = pnand %p2202_p4, %p2328_p5 }
 0x2e4   : > { %p2208_p11 = por %p2207_p10, %p2206_p9 }
 0x2e5   : > { %p2204_p8 = pneg %p2203_p7 }
 0x2e6   : > { %p2210_p13 = por %p2209_p12, %p2208_p11 }
 0x2e8   : > { %p2211_p0 = pnand %p2210_p13, %p2204_p8 }
 0x2ea   : > { %2214 = shalt.err (!%p2211_p0)
}
 0x2eb   : > { %s2253_s16 = smov 16   ;;  %s2254_s18 = smov 1  }
 0x2ec   : > { %1981 = dma.vmem_to_hbm [thread:$0]  (%p2328_p5), %s3366_s17, 256, %s3364_s20, %s3372_s26, %s2253_s16, %s2253_s16, %s2254_s18  }
 0x2ed PF: > { %p1987_p1 = scmp.ge.s32.totalorder %s2249_s24, 2  ;;  %s1795_s19 = sand.u32 1, %s2237_s21  }
 0x2ee   : > { %s1796_s25 = scalar_lea.sflag [#allocation3], %s1795_s19 }
 0x2ef   : > { %p1984_p2 = pnand %p1987_p1, %p2332_p6 }
 0x2f1   : > { %2232 = dma.done.wait (!%p1984_p2), %s1796_s25, 256  }
 0x2f2   : > { %2234 = vsyncadd (!%p1984_p2), %s1796_s25, 4294967040  ;;  %p17_p3 = scmp.ge.s32.totalorder %s2315_s27, 4   ;;  %s3460_s21 = smov %s2241_s22 }
 0x2f3   : > { %s3461_s22 = smov %s2245_s23  ;;  %s3462_s23 = smov %s2326_s30 }
 0x2f4   : > { %s3463_s24 = smov %s2315_s27  ;;  %19 = sbr.rel (!%p17_p3) target bundleno = 3 (0x3), region = 90 }
 0x2fb   :  { %1810 = vsyncpa [#allocation3], 1 }
 0x2fc   :  { %1812 = vsyncpa [#allocation3 + $0x1], 1 }

</bundles_post_ra>
